<compile_context>
chip_gen: v7x
topology: tpu7x:2x2x1
jax: 0.10.0
libtpu: 0.0.40
codegen_flags: <defaults>
</compile_context>

<pallas_src>
import functools

import jax
import jax.numpy as jnp
from jax.experimental import pallas as pl
from jax.experimental.pallas import tpu as pltpu

LANE = 128


def _round_up(x, m):
    return ((x + m - 1) // m) * m


# ----------------------------------------------------------------------------
# Static packed-weight layouts (row offsets are multiples of 8 -> aligned slices)
# ----------------------------------------------------------------------------

def _w8h_layout(input_size, hidden_dim, n_layers):
    """Row layout of the single (rows, 8H) LSTM-weight array."""
    H = hidden_dim
    offs, row = [], 0
    for layer in range(n_layers):
        d_in = input_size if layer == 0 else 2 * H
        wih_off = row
        row += _round_up(d_in, 8)
        whh_off = row
        row += _round_up(H, 8)
        b_off = row
        row += 8
        offs.append((wih_off, d_in, whh_off, b_off))
    return offs, row


def _wfc_layout(hidden_dim, seq_len):
    """Row layout of the single (rows, 128) FC-head weight array."""
    H = hidden_dim
    fc1_w_off = 0
    fc1_b_off = _round_up(seq_len * 2 * H, 8)
    fc2_w_off = fc1_b_off + 8
    fc2_b_off = fc2_w_off + LANE
    total = fc2_b_off + 8
    return (fc1_w_off, fc1_b_off, fc2_w_off, fc2_b_off), total


# ----------------------------------------------------------------------------
# Fused Pallas kernel (entire model forward)
# ----------------------------------------------------------------------------

def _make_fused_kernel(n_layers, T, H, Bp, layer_offs, fc_offs):
    GH = 4 * H
    fc1_w_off, fc1_b_off, fc2_w_off, fc2_b_off = fc_offs

    def kernel(x_ref, w8h_ref, wfc_ref, out_ref):
        # x_ref   : (T*Bp, D0)   time-major flattened input
        # w8h_ref : (R8,  8H)    per-layer [wih_cat | whh_cat | bias] blocks
        # wfc_ref : (RF, 128)    [fc1_w | fc1_b | fc2_w | fc2_b] blocks
        # out_ref : (Bp, 128)    lane-dense padded output
        NF = out_ref.shape[1]

        def dot32(a, b):
            return jnp.dot(a, b, preferred_element_type=jnp.float32)

        # fc1 accumulator, seeded with the bias row (broadcasts on first add).
        h1 = wfc_ref[fc1_b_off:fc1_b_off + 1, :]

        cur_fwd = None   # per-timestep (Bp, H) hidden states feeding the next layer
        cur_rev = None

        for layer in range(n_layers):
            wih_off, d_in, whh_off, b_off = layer_offs[layer]
            whh = w8h_ref[whh_off:whh_off + H, :]        # (H, 8H), reused all T steps
            bias = w8h_ref[b_off:b_off + 1, :]           # (1, 8H)
            is_last = layer == n_layers - 1

            # Hoisted input projection for ALL timesteps and BOTH directions.
            if layer == 0:
                xproj = dot32(x_ref[...], w8h_ref[wih_off:wih_off + d_in, :]) + bias
            else:
                hf_all = jnp.concatenate(cur_fwd, axis=0)    # (T*Bp, H) time-major
                hr_all = jnp.concatenate(cur_rev, axis=0)    # (T*Bp, H)
                xproj = (dot32(hf_all, w8h_ref[wih_off:wih_off + H, :])
                         + dot32(hr_all, w8h_ref[wih_off + H:wih_off + 2 * H, :])
                         + bias)

            hcat = jnp.zeros((2 * Bp, H), jnp.float32)   # [hf ; hr]
            ccat = jnp.zeros((2 * Bp, H), jnp.float32)
            nxt_fwd = [None] * T
            nxt_rev = [None] * T

            for t in range(T):                           # T is tiny & static -> unrolled
                tr = T - 1 - t
                pre = jnp.concatenate(
                    [xproj[t * Bp:(t + 1) * Bp, 0:GH],           # fwd gates, time t
                     xproj[tr * Bp:(tr + 1) * Bp, GH:2 * GH]],   # rev gates, time tr
                    axis=0)                                       # (2Bp, 4H)
                if t == 0:
                    gates = pre                                   # zero initial state
                else:
                    rec = dot32(hcat, whh)                        # ONE merged MXU push
                    gates = pre + jnp.concatenate(
                        [rec[0:Bp, 0:GH], rec[Bp:2 * Bp, GH:2 * GH]], axis=0)

                sg = jax.nn.sigmoid(gates)                        # single EUP pass
                i_ = sg[:, 0 * H:1 * H]                           # PyTorch order [i,f,g,o]
                f_ = sg[:, 1 * H:2 * H]
                g_ = 2.0 * sg[:, 2 * H:3 * H] - 1.0               # tanh via pre-scaled sigmoid
                o_ = sg[:, 3 * H:4 * H]
                ccat = i_ * g_ if t == 0 else f_ * ccat + i_ * g_
                hcat = o_ * jnp.tanh(ccat)

                hf = hcat[0:Bp, :]
                hr = hcat[Bp:2 * Bp, :]
                if is_last:
                    # fc1 as accumulating matmuls against static row slices of fc1_w.
                    # Feature order matches torch out.view(B,-1): [hf_0|hr_0|hf_1|hr_1|...]
                    h1 = h1 + dot32(hf, wfc_ref[fc1_w_off + t * 2 * H:
                                                fc1_w_off + t * 2 * H + H, :])
                    h1 = h1 + dot32(hr, wfc_ref[fc1_w_off + tr * 2 * H + H:
                                                fc1_w_off + (tr + 1) * 2 * H, :])
                else:
                    nxt_fwd[t] = hf
                    nxt_rev[tr] = hr

            cur_fwd, cur_rev = nxt_fwd, nxt_rev

        # fc2 (no activation in between), 128-lane padded output store.
        fc2_w = wfc_ref[fc2_w_off:fc2_w_off + NF, :]
        fc2_b = wfc_ref[fc2_b_off:fc2_b_off + 1, :]
        out_ref[...] = (dot32(h1, fc2_w) + fc2_b).astype(out_ref.dtype)

    return kernel


# ----------------------------------------------------------------------------
# Wrapper
# ----------------------------------------------------------------------------

def lstm_model_forward(x, packed, *, hidden_dim, n_layers, output_size):
    B, T, D0 = x.shape
    H = hidden_dim
    # Structural coupling in the original module: fc1_in = H*4*2 == T*2*H => T == 4.
    assert T * 2 * H == H * 4 * 2, "fc1 of the original module requires seq_len == 4"

    Bp = _round_up(max(B, 8), 8)                 # fill the 8-row sublane group
    xp = jnp.zeros((Bp, T, D0), jnp.float32).at[:B].set(x.astype(jnp.float32))
    # Time-major flatten so each timestep is a contiguous (Bp, D0) row block.
    x_tm = jnp.transpose(xp, (1, 0, 2)).reshape(T * Bp, D0)

    layer_offs, _ = _w8h_layout(D0, H, n_layers)   # static (from shapes/kwargs)
    fc_offs, _ = _wfc_layout(H, T)

    vmem = pl.BlockSpec(memory_space=pltpu.MemorySpace.VMEM)
    out_pad = pl.pallas_call(
        _make_fused_kernel(n_layers, T, H, Bp, tuple(layer_offs), fc_offs),
        out_shape=jax.ShapeDtypeStruct((Bp, LANE), jnp.float32),
        in_specs=[vmem, vmem, vmem],
        out_specs=vmem,
        # Footprint < 1 MiB; keep the scoped-VMEM request small (v7x has 64 MiB total).
        compiler_params=pltpu.CompilerParams(vmem_limit_bytes=8 * 1024 * 1024),
    )(x_tm, packed["w8h"], packed["wfc"])
    # TODO(synk): for throughput over many sequences, add a leading batch-tile grid
    # with dimension_semantics=("parallel",) so Mosaic shards invocations across TCs.
    return out_pad[:B, :output_size]


# ----------------------------------------------------------------------------
# Parameter init (PyTorch layout) + packing for the fused kernel
# ----------------------------------------------------------------------------

def init_params(key, input_size, output_size, hidden_dim, n_layers):
    H = hidden_dim
    bound = 1.0 / (H ** 0.5)
    keys = iter(jax.random.split(key, 8 * n_layers + 4))
    params = {"lstm": []}
    for layer in range(n_layers):
        d_in = input_size if layer == 0 else 2 * H
        layer_params = []
        for _direction in range(2):  # forward, reverse
            wih = jax.random.uniform(next(keys), (d_in, 4 * H), jnp.float32, -bound, bound)
            whh = jax.random.uniform(next(keys), (H, 4 * H), jnp.float32, -bound, bound)
            bih = jax.random.uniform(next(keys), (4 * H,), jnp.float32, -bound, bound)
            bhh = jax.random.uniform(next(keys), (4 * H,), jnp.float32, -bound, bound)
            layer_params += [wih, whh, (bih + bhh)[None, :]]
        params["lstm"].append(tuple(layer_params))
    fc1_in = H * 4 * 2
    b1 = 1.0 / (fc1_in ** 0.5)
    params["fc1_w"] = jax.random.uniform(next(keys), (fc1_in, 75), jnp.float32, -b1, b1)
    params["fc1_b"] = jax.random.uniform(next(keys), (1, 75), jnp.float32, -b1, b1)
    b2 = 1.0 / (75 ** 0.5)
    params["fc2_w"] = jax.random.uniform(next(keys), (75, output_size), jnp.float32, -b2, b2)
    params["fc2_b"] = jax.random.uniform(next(keys), (1, output_size), jnp.float32, -b2, b2)
    return params


def pack_params(params):
    """Pack all weights into two lane-dense 2-D arrays with aligned row blocks.

    - LSTM array (rows, 8H): per layer [wih_cat | whh_cat | bias], fwd|rev concatenated
      along lanes, g-gate columns pre-scaled by 2 (tanh(x) = 2*sigmoid(2x) - 1).
    - FC array (rows, 128): [fc1_w | fc1_b | fc2_w | fc2_b], zero-padded to 128 lanes.
    """
    wih_f0, whh_f0 = params["lstm"][0][0], params["lstm"][0][1]
    d_in0 = wih_f0.shape[0]
    H = whh_f0.shape[0]
    n_layers = len(params["lstm"])
    T = params["fc1_w"].shape[0] // (2 * H)

    offs, total_rows = _w8h_layout(d_in0, H, n_layers)
    gscale = (jnp.ones((8 * H,), jnp.float32)
              .at[2 * H:3 * H].set(2.0)      # fwd g-gate columns
              .at[6 * H:7 * H].set(2.0))     # rev g-gate columns
    w8h = jnp.zeros((total_rows, 8 * H), jnp.float32)
    for layer, (wih_f, whh_f, b_f, wih_r, whh_r, b_r) in enumerate(params["lstm"]):
        wih_off, d_in, whh_off, b_off = offs[layer]
        wih_cat = jnp.concatenate([wih_f, wih_r], axis=1) * gscale   # (d_in, 8H)
        whh_cat = jnp.concatenate([whh_f, whh_r], axis=1) * gscale   # (H, 8H)
        b_cat = jnp.concatenate([b_f, b_r], axis=1) * gscale         # (1, 8H)
        w8h = w8h.at[wih_off:wih_off + d_in, :].set(wih_cat)
        w8h = w8h.at[whh_off:whh_off + H, :].set(whh_cat)
        w8h = w8h.at[b_off:b_off + 1, :].set(b_cat)

    (fc1_w_off, fc1_b_off, fc2_w_off, fc2_b_off), fc_rows = _wfc_layout(H, T)
    wfc = jnp.zeros((fc_rows, LANE), jnp.float32)
    fc1_w, fc1_b = params["fc1_w"], params["fc1_b"]
    fc2_w, fc2_b = params["fc2_w"], params["fc2_b"]
    wfc = wfc.at[fc1_w_off:fc1_w_off + fc1_w.shape[0], :fc1_w.shape[1]].set(fc1_w)
    wfc = wfc.at[fc1_b_off:fc1_b_off + 1, :fc1_b.shape[1]].set(fc1_b)
    wfc = wfc.at[fc2_w_off:fc2_w_off + fc2_w.shape[0], :fc2_w.shape[1]].set(fc2_w)
    wfc = wfc.at[fc2_b_off:fc2_b_off + 1, :fc2_b.shape[1]].set(fc2_b)
    return {"w8h": w8h, "wfc": wfc}


# ----------------------------------------------------------------------------
# Pure-JAX reference for validation (PyTorch semantics, original params)
# ----------------------------------------------------------------------------

def lstm_model_reference(x, params):
    hp = jax.lax.Precision.HIGHEST
    out = x.astype(jnp.float32)
    for (wih_f, whh_f, b_f, wih_r, whh_r, b_r) in params["lstm"]:
        B, T, _ = out.shape
        H = whh_f.shape[0]

        def run_dir(xs, wih, whh, b):
            h = jnp.zeros((B, H), jnp.float32)
            c = jnp.zeros((B, H), jnp.float32)
            hs = []
            for t in range(T):
                gates = (jnp.dot(xs[:, t, :], wih, precision=hp)
                         + jnp.dot(h, whh, precision=hp) + b)
                i = jax.nn.sigmoid(gates[:, :H])
                f = jax.nn.sigmoid(gates[:, H:2 * H])
                g = jnp.tanh(gates[:, 2 * H:3 * H])
                o = jax.nn.sigmoid(gates[:, 3 * H:])
                c = f * c + i * g
                h = o * jnp.tanh(c)
                hs.append(h)
            return jnp.stack(hs, axis=1)

        of = run_dir(out, wih_f, whh_f, b_f)
        orv = run_dir(out[:, ::-1, :], wih_r, whh_r, b_r)[:, ::-1, :]
        out = jnp.concatenate([of, orv], axis=-1)
    flat = out.reshape(out.shape[0], -1)
    h = jnp.dot(flat, params["fc1_w"], precision=hp) + params["fc1_b"]
    return jnp.dot(h, params["fc2_w"], precision=hp) + params["fc2_b"]


# ----------------------------------------------------------------------------
# Main
# ----------------------------------------------------------------------------

if __name__ == "__main__":
    batch = 2
    seq_len = 4          # forced by fc1: hidden_dim*4*2 == seq_len * 2 * hidden_dim
    input_size = 16
    hidden_dim = 32
    n_layers = 2
    output_size = 5

    key = jax.random.PRNGKey(0)
    kx, kp = jax.random.split(key)
    x = jax.random.normal(kx, (batch, seq_len, input_size), jnp.float32)
    params = init_params(kp, input_size, output_size, hidden_dim, n_layers)
    packed = pack_params(params)

    fwd = jax.jit(functools.partial(lstm_model_forward,
                                    hidden_dim=hidden_dim,
                                    n_layers=n_layers,
                                    output_size=output_size))

    out = jax.block_until_ready(fwd(x, packed))
    ref = jax.block_until_ready(lstm_model_reference(x, params))

    assert out.shape == (batch, output_size)
    max_err = float(jnp.max(jnp.abs(out - ref)))
    assert jnp.allclose(out, ref, atol=1e-3, rtol=1e-3), (
        f"mismatch vs JAX reference (max abs err {max_err})")
    print("KERNEL_OK")
</pallas_src>

<mosaic_0001>
module attributes {stable_mosaic.version = 11 : i64} {
  func.func @kernel(%arg0: memref<32x16xf32, #tpu.memory_space<vmem>>, %arg1: memref<160x256xf32, #tpu.memory_space<vmem>>, %arg2: memref<400x128xf32, #tpu.memory_space<vmem>>, %arg3: memref<8x128xf32, #tpu.memory_space<vmem>>) attributes {dimension_semantics = [], scalar_prefetch = 0 : i64, scratch_operands = 0 : i64, tpu.core_type = #tpu.core_type<tc>} {
    %c256 = arith.constant 256 : index
    %c0 = arith.constant 0 : index
    %0 = vector.load %arg2[%c256, %c0] : memref<400x128xf32, #tpu.memory_space<vmem>>, vector<1x128xf32>
    %c16 = arith.constant 16 : index
    %c0_0 = arith.constant 0 : index
    %1 = vector.load %arg1[%c16, %c0_0] : memref<160x256xf32, #tpu.memory_space<vmem>>, vector<32x256xf32>
    %c48 = arith.constant 48 : index
    %c0_1 = arith.constant 0 : index
    %2 = vector.load %arg1[%c48, %c0_1] : memref<160x256xf32, #tpu.memory_space<vmem>>, vector<1x256xf32>
    %c0_2 = arith.constant 0 : index
    %c0_3 = arith.constant 0 : index
    %3 = vector.load %arg0[%c0_2, %c0_3] : memref<32x16xf32, #tpu.memory_space<vmem>>, vector<32x16xf32>
    %c0_4 = arith.constant 0 : index
    %c0_5 = arith.constant 0 : index
    %4 = vector.load %arg1[%c0_4, %c0_5] : memref<160x256xf32, #tpu.memory_space<vmem>>, vector<16x256xf32>
    %cst = arith.constant dense<0.000000e+00> : vector<32x256xf32>
    %5 = tpu.matmul %3, %4, %cst {dimension_numbers = #tpu.dot_dimension_numbers<[1], [0], [0], [1], [0, 0, 1, 1], [], []>} : vector<32x16xf32>, vector<16x256xf32>, vector<32x256xf32> -> vector<32x256xf32>
    %6 = vector.broadcast %2 : vector<1x256xf32> to vector<32x256xf32>
    %7 = arith.addf %5, %6 : vector<32x256xf32>
    %8 = vector.extract_strided_slice %7 {offsets = [0, 0], sizes = [8, 128], strides = [1, 1]} : vector<32x256xf32> to vector<8x128xf32>
    %9 = vector.extract_strided_slice %7 {offsets = [24, 128], sizes = [8, 128], strides = [1, 1]} : vector<32x256xf32> to vector<8x128xf32>
    %10 = tpu.concatenate %8, %9 in 0 : vector<8x128xf32>, vector<8x128xf32> -> vector<16x128xf32>
    %11 = arith.negf %10 : vector<16x128xf32>
    %12 = math.exp %11 : vector<16x128xf32>
    %cst_6 = arith.constant 1.000000e+00 : f32
    %13 = vector.broadcast %cst_6 : f32 to vector<16x128xf32>
    %14 = arith.addf %13, %12 : vector<16x128xf32>
    %15 = arith.divf %13, %14 : vector<16x128xf32>
    %16 = vector.extract_strided_slice %15 {offsets = [0, 0], sizes = [16, 32], strides = [1, 1]} : vector<16x128xf32> to vector<16x32xf32>
    %17 = vector.extract_strided_slice %15 {offsets = [0, 64], sizes = [16, 32], strides = [1, 1]} : vector<16x128xf32> to vector<16x32xf32>
    %cst_7 = arith.constant 2.000000e+00 : f32
    %18 = vector.broadcast %cst_7 : f32 to vector<16x32xf32>
    %19 = arith.mulf %18, %17 : vector<16x32xf32>
    %cst_8 = arith.constant 1.000000e+00 : f32
    %20 = vector.broadcast %cst_8 : f32 to vector<16x32xf32>
    %21 = arith.subf %19, %20 : vector<16x32xf32>
    %22 = vector.extract_strided_slice %15 {offsets = [0, 96], sizes = [16, 32], strides = [1, 1]} : vector<16x128xf32> to vector<16x32xf32>
    %23 = arith.mulf %16, %21 : vector<16x32xf32>
    %24 = math.tanh %23 : vector<16x32xf32>
    %25 = arith.mulf %22, %24 : vector<16x32xf32>
    %26 = vector.extract_strided_slice %25 {offsets = [0, 0], sizes = [8, 32], strides = [1, 1]} : vector<16x32xf32> to vector<8x32xf32>
    %27 = vector.extract_strided_slice %25 {offsets = [8, 0], sizes = [8, 32], strides = [1, 1]} : vector<16x32xf32> to vector<8x32xf32>
    %28 = vector.extract_strided_slice %7 {offsets = [8, 0], sizes = [8, 128], strides = [1, 1]} : vector<32x256xf32> to vector<8x128xf32>
    %29 = vector.extract_strided_slice %7 {offsets = [16, 128], sizes = [8, 128], strides = [1, 1]} : vector<32x256xf32> to vector<8x128xf32>
    %30 = tpu.concatenate %28, %29 in 0 : vector<8x128xf32>, vector<8x128xf32> -> vector<16x128xf32>
    %cst_9 = arith.constant dense<0.000000e+00> : vector<16x256xf32>
    %31 = tpu.matmul %25, %1, %cst_9 {dimension_numbers = #tpu.dot_dimension_numbers<[1], [0], [0], [1], [0, 0, 1, 1], [], []>} : vector<16x32xf32>, vector<32x256xf32>, vector<16x256xf32> -> vector<16x256xf32>
    %32 = vector.extract_strided_slice %31 {offsets = [0, 0], sizes = [8, 128], strides = [1, 1]} : vector<16x256xf32> to vector<8x128xf32>
    %33 = vector.extract_strided_slice %31 {offsets = [8, 128], sizes = [8, 128], strides = [1, 1]} : vector<16x256xf32> to vector<8x128xf32>
    %34 = tpu.concatenate %32, %33 in 0 : vector<8x128xf32>, vector<8x128xf32> -> vector<16x128xf32>
    %35 = arith.addf %30, %34 : vector<16x128xf32>
    %36 = arith.negf %35 : vector<16x128xf32>
    %37 = math.exp %36 : vector<16x128xf32>
    %cst_10 = arith.constant 1.000000e+00 : f32
    %38 = vector.broadcast %cst_10 : f32 to vector<16x128xf32>
    %39 = arith.addf %38, %37 : vector<16x128xf32>
    %40 = arith.divf %38, %39 : vector<16x128xf32>
    %41 = vector.extract_strided_slice %40 {offsets = [0, 0], sizes = [16, 32], strides = [1, 1]} : vector<16x128xf32> to vector<16x32xf32>
    %42 = vector.extract_strided_slice %40 {offsets = [0, 32], sizes = [16, 32], strides = [1, 1]} : vector<16x128xf32> to vector<16x32xf32>
    %43 = vector.extract_strided_slice %40 {offsets = [0, 64], sizes = [16, 32], strides = [1, 1]} : vector<16x128xf32> to vector<16x32xf32>
    %cst_11 = arith.constant 2.000000e+00 : f32
    %44 = vector.broadcast %cst_11 : f32 to vector<16x32xf32>
    %45 = arith.mulf %44, %43 : vector<16x32xf32>
    %cst_12 = arith.constant 1.000000e+00 : f32
    %46 = vector.broadcast %cst_12 : f32 to vector<16x32xf32>
    %47 = arith.subf %45, %46 : vector<16x32xf32>
    %48 = vector.extract_strided_slice %40 {offsets = [0, 96], sizes = [16, 32], strides = [1, 1]} : vector<16x128xf32> to vector<16x32xf32>
    %49 = arith.mulf %42, %23 : vector<16x32xf32>
    %50 = arith.mulf %41, %47 : vector<16x32xf32>
    %51 = arith.addf %49, %50 : vector<16x32xf32>
    %52 = math.tanh %51 : vector<16x32xf32>
    %53 = arith.mulf %48, %52 : vector<16x32xf32>
    %54 = vector.extract_strided_slice %53 {offsets = [0, 0], sizes = [8, 32], strides = [1, 1]} : vector<16x32xf32> to vector<8x32xf32>
    %55 = vector.extract_strided_slice %53 {offsets = [8, 0], sizes = [8, 32], strides = [1, 1]} : vector<16x32xf32> to vector<8x32xf32>
    %56 = vector.extract_strided_slice %7 {offsets = [16, 0], sizes = [8, 128], strides = [1, 1]} : vector<32x256xf32> to vector<8x128xf32>
    %57 = vector.extract_strided_slice %7 {offsets = [8, 128], sizes = [8, 128], strides = [1, 1]} : vector<32x256xf32> to vector<8x128xf32>
    %58 = tpu.concatenate %56, %57 in 0 : vector<8x128xf32>, vector<8x128xf32> -> vector<16x128xf32>
    %cst_13 = arith.constant dense<0.000000e+00> : vector<16x256xf32>
    %59 = tpu.matmul %53, %1, %cst_13 {dimension_numbers = #tpu.dot_dimension_numbers<[1], [0], [0], [1], [0, 0, 1, 1], [], []>} : vector<16x32xf32>, vector<32x256xf32>, vector<16x256xf32> -> vector<16x256xf32>
    %60 = vector.extract_strided_slice %59 {offsets = [0, 0], sizes = [8, 128], strides = [1, 1]} : vector<16x256xf32> to vector<8x128xf32>
    %61 = vector.extract_strided_slice %59 {offsets = [8, 128], sizes = [8, 128], strides = [1, 1]} : vector<16x256xf32> to vector<8x128xf32>
    %62 = tpu.concatenate %60, %61 in 0 : vector<8x128xf32>, vector<8x128xf32> -> vector<16x128xf32>
    %63 = arith.addf %58, %62 : vector<16x128xf32>
    %64 = arith.negf %63 : vector<16x128xf32>
    %65 = math.exp %64 : vector<16x128xf32>
    %cst_14 = arith.constant 1.000000e+00 : f32
    %66 = vector.broadcast %cst_14 : f32 to vector<16x128xf32>
    %67 = arith.addf %66, %65 : vector<16x128xf32>
    %68 = arith.divf %66, %67 : vector<16x128xf32>
    %69 = vector.extract_strided_slice %68 {offsets = [0, 0], sizes = [16, 32], strides = [1, 1]} : vector<16x128xf32> to vector<16x32xf32>
    %70 = vector.extract_strided_slice %68 {offsets = [0, 32], sizes = [16, 32], strides = [1, 1]} : vector<16x128xf32> to vector<16x32xf32>
    %71 = vector.extract_strided_slice %68 {offsets = [0, 64], sizes = [16, 32], strides = [1, 1]} : vector<16x128xf32> to vector<16x32xf32>
    %cst_15 = arith.constant 2.000000e+00 : f32
    %72 = vector.broadcast %cst_15 : f32 to vector<16x32xf32>
    %73 = arith.mulf %72, %71 : vector<16x32xf32>
    %cst_16 = arith.constant 1.000000e+00 : f32
    %74 = vector.broadcast %cst_16 : f32 to vector<16x32xf32>
    %75 = arith.subf %73, %74 : vector<16x32xf32>
    %76 = vector.extract_strided_slice %68 {offsets = [0, 96], sizes = [16, 32], strides = [1, 1]} : vector<16x128xf32> to vector<16x32xf32>
    %77 = arith.mulf %70, %51 : vector<16x32xf32>
    %78 = arith.mulf %69, %75 : vector<16x32xf32>
    %79 = arith.addf %77, %78 : vector<16x32xf32>
    %80 = math.tanh %79 : vector<16x32xf32>
    %81 = arith.mulf %76, %80 : vector<16x32xf32>
    %82 = vector.extract_strided_slice %81 {offsets = [0, 0], sizes = [8, 32], strides = [1, 1]} : vector<16x32xf32> to vector<8x32xf32>
    %83 = vector.extract_strided_slice %81 {offsets = [8, 0], sizes = [8, 32], strides = [1, 1]} : vector<16x32xf32> to vector<8x32xf32>
    %84 = vector.extract_strided_slice %7 {offsets = [24, 0], sizes = [8, 128], strides = [1, 1]} : vector<32x256xf32> to vector<8x128xf32>
    %85 = vector.extract_strided_slice %7 {offsets = [0, 128], sizes = [8, 128], strides = [1, 1]} : vector<32x256xf32> to vector<8x128xf32>
    %86 = tpu.concatenate %84, %85 in 0 : vector<8x128xf32>, vector<8x128xf32> -> vector<16x128xf32>
    %cst_17 = arith.constant dense<0.000000e+00> : vector<16x256xf32>
    %87 = tpu.matmul %81, %1, %cst_17 {dimension_numbers = #tpu.dot_dimension_numbers<[1], [0], [0], [1], [0, 0, 1, 1], [], []>} : vector<16x32xf32>, vector<32x256xf32>, vector<16x256xf32> -> vector<16x256xf32>
    %88 = vector.extract_strided_slice %87 {offsets = [0, 0], sizes = [8, 128], strides = [1, 1]} : vector<16x256xf32> to vector<8x128xf32>
    %89 = vector.extract_strided_slice %87 {offsets = [8, 128], sizes = [8, 128], strides = [1, 1]} : vector<16x256xf32> to vector<8x128xf32>
    %90 = tpu.concatenate %88, %89 in 0 : vector<8x128xf32>, vector<8x128xf32> -> vector<16x128xf32>
    %91 = arith.addf %86, %90 : vector<16x128xf32>
    %92 = arith.negf %91 : vector<16x128xf32>
    %93 = math.exp %92 : vector<16x128xf32>
    %cst_18 = arith.constant 1.000000e+00 : f32
    %94 = vector.broadcast %cst_18 : f32 to vector<16x128xf32>
    %95 = arith.addf %94, %93 : vector<16x128xf32>
    %96 = arith.divf %94, %95 : vector<16x128xf32>
    %97 = vector.extract_strided_slice %96 {offsets = [0, 0], sizes = [16, 32], strides = [1, 1]} : vector<16x128xf32> to vector<16x32xf32>
    %98 = vector.extract_strided_slice %96 {offsets = [0, 32], sizes = [16, 32], strides = [1, 1]} : vector<16x128xf32> to vector<16x32xf32>
    %99 = vector.extract_strided_slice %96 {offsets = [0, 64], sizes = [16, 32], strides = [1, 1]} : vector<16x128xf32> to vector<16x32xf32>
    %cst_19 = arith.constant 2.000000e+00 : f32
    %100 = vector.broadcast %cst_19 : f32 to vector<16x32xf32>
    %101 = arith.mulf %100, %99 : vector<16x32xf32>
    %cst_20 = arith.constant 1.000000e+00 : f32
    %102 = vector.broadcast %cst_20 : f32 to vector<16x32xf32>
    %103 = arith.subf %101, %102 : vector<16x32xf32>
    %104 = vector.extract_strided_slice %96 {offsets = [0, 96], sizes = [16, 32], strides = [1, 1]} : vector<16x128xf32> to vector<16x32xf32>
    %105 = arith.mulf %98, %79 : vector<16x32xf32>
    %106 = arith.mulf %97, %103 : vector<16x32xf32>
    %107 = arith.addf %105, %106 : vector<16x32xf32>
    %108 = math.tanh %107 : vector<16x32xf32>
    %109 = arith.mulf %104, %108 : vector<16x32xf32>
    %110 = vector.extract_strided_slice %109 {offsets = [0, 0], sizes = [8, 32], strides = [1, 1]} : vector<16x32xf32> to vector<8x32xf32>
    %111 = vector.extract_strided_slice %109 {offsets = [8, 0], sizes = [8, 32], strides = [1, 1]} : vector<16x32xf32> to vector<8x32xf32>
    %c120 = arith.constant 120 : index
    %c0_21 = arith.constant 0 : index
    %112 = vector.load %arg1[%c120, %c0_21] : memref<160x256xf32, #tpu.memory_space<vmem>>, vector<32x256xf32>
    %c152 = arith.constant 152 : index
    %c0_22 = arith.constant 0 : index
    %113 = vector.load %arg1[%c152, %c0_22] : memref<160x256xf32, #tpu.memory_space<vmem>>, vector<1x256xf32>
    %114 = tpu.concatenate %26, %54, %82, %110 in 0 : vector<8x32xf32>, vector<8x32xf32>, vector<8x32xf32>, vector<8x32xf32> -> vector<32x32xf32>
    %115 = tpu.concatenate %111, %83, %55, %27 in 0 : vector<8x32xf32>, vector<8x32xf32>, vector<8x32xf32>, vector<8x32xf32> -> vector<32x32xf32>
    %c56 = arith.constant 56 : index
    %c0_23 = arith.constant 0 : index
    %116 = vector.load %arg1[%c56, %c0_23] : memref<160x256xf32, #tpu.memory_space<vmem>>, vector<32x256xf32>
    %cst_24 = arith.constant dense<0.000000e+00> : vector<32x256xf32>
    %117 = tpu.matmul %114, %116, %cst_24 {dimension_numbers = #tpu.dot_dimension_numbers<[1], [0], [0], [1], [0, 0, 1, 1], [], []>} : vector<32x32xf32>, vector<32x256xf32>, vector<32x256xf32> -> vector<32x256xf32>
    %c88 = arith.constant 88 : index
    %c0_25 = arith.constant 0 : index
    %118 = vector.load %arg1[%c88, %c0_25] : memref<160x256xf32, #tpu.memory_space<vmem>>, vector<32x256xf32>
    %cst_26 = arith.constant dense<0.000000e+00> : vector<32x256xf32>
    %119 = tpu.matmul %115, %118, %cst_26 {dimension_numbers = #tpu.dot_dimension_numbers<[1], [0], [0], [1], [0, 0, 1, 1], [], []>} : vector<32x32xf32>, vector<32x256xf32>, vector<32x256xf32> -> vector<32x256xf32>
    %120 = arith.addf %117, %119 : vector<32x256xf32>
    %121 = vector.broadcast %113 : vector<1x256xf32> to vector<32x256xf32>
    %122 = arith.addf %120, %121 : vector<32x256xf32>
    %123 = vector.extract_strided_slice %122 {offsets = [0, 0], sizes = [8, 128], strides = [1, 1]} : vector<32x256xf32> to vector<8x128xf32>
    %124 = vector.extract_strided_slice %122 {offsets = [24, 128], sizes = [8, 128], strides = [1, 1]} : vector<32x256xf32> to vector<8x128xf32>
    %125 = tpu.concatenate %123, %124 in 0 : vector<8x128xf32>, vector<8x128xf32> -> vector<16x128xf32>
    %126 = arith.negf %125 : vector<16x128xf32>
    %127 = math.exp %126 : vector<16x128xf32>
    %cst_27 = arith.constant 1.000000e+00 : f32
    %128 = vector.broadcast %cst_27 : f32 to vector<16x128xf32>
    %129 = arith.addf %128, %127 : vector<16x128xf32>
    %130 = arith.divf %128, %129 : vector<16x128xf32>
    %131 = vector.extract_strided_slice %130 {offsets = [0, 0], sizes = [16, 32], strides = [1, 1]} : vector<16x128xf32> to vector<16x32xf32>
    %132 = vector.extract_strided_slice %130 {offsets = [0, 64], sizes = [16, 32], strides = [1, 1]} : vector<16x128xf32> to vector<16x32xf32>
    %cst_28 = arith.constant 2.000000e+00 : f32
    %133 = vector.broadcast %cst_28 : f32 to vector<16x32xf32>
    %134 = arith.mulf %133, %132 : vector<16x32xf32>
    %cst_29 = arith.constant 1.000000e+00 : f32
    %135 = vector.broadcast %cst_29 : f32 to vector<16x32xf32>
    %136 = arith.subf %134, %135 : vector<16x32xf32>
    %137 = vector.extract_strided_slice %130 {offsets = [0, 96], sizes = [16, 32], strides = [1, 1]} : vector<16x128xf32> to vector<16x32xf32>
    %138 = arith.mulf %131, %136 : vector<16x32xf32>
    %139 = math.tanh %138 : vector<16x32xf32>
    %140 = arith.mulf %137, %139 : vector<16x32xf32>
    %141 = vector.extract_strided_slice %140 {offsets = [0, 0], sizes = [8, 32], strides = [1, 1]} : vector<16x32xf32> to vector<8x32xf32>
    %142 = vector.extract_strided_slice %140 {offsets = [8, 0], sizes = [8, 32], strides = [1, 1]} : vector<16x32xf32> to vector<8x32xf32>
    %c0_30 = arith.constant 0 : index
    %c0_31 = arith.constant 0 : index
    %143 = vector.load %arg2[%c0_30, %c0_31] : memref<400x128xf32, #tpu.memory_space<vmem>>, vector<32x128xf32>
    %cst_32 = arith.constant dense<0.000000e+00> : vector<8x128xf32>
    %144 = tpu.matmul %141, %143, %cst_32 {dimension_numbers = #tpu.dot_dimension_numbers<[1], [0], [0], [1], [0, 0, 1, 1], [], []>} : vector<8x32xf32>, vector<32x128xf32>, vector<8x128xf32> -> vector<8x128xf32>
    %145 = vector.broadcast %0 : vector<1x128xf32> to vector<8x128xf32>
    %146 = arith.addf %145, %144 : vector<8x128xf32>
    %c224 = arith.constant 224 : index
    %c0_33 = arith.constant 0 : index
    %147 = vector.load %arg2[%c224, %c0_33] : memref<400x128xf32, #tpu.memory_space<vmem>>, vector<32x128xf32>
    %cst_34 = arith.constant dense<0.000000e+00> : vector<8x128xf32>
    %148 = tpu.matmul %142, %147, %cst_34 {dimension_numbers = #tpu.dot_dimension_numbers<[1], [0], [0], [1], [0, 0, 1, 1], [], []>} : vector<8x32xf32>, vector<32x128xf32>, vector<8x128xf32> -> vector<8x128xf32>
    %149 = arith.addf %146, %148 : vector<8x128xf32>
    %150 = vector.extract_strided_slice %122 {offsets = [8, 0], sizes = [8, 128], strides = [1, 1]} : vector<32x256xf32> to vector<8x128xf32>
    %151 = vector.extract_strided_slice %122 {offsets = [16, 128], sizes = [8, 128], strides = [1, 1]} : vector<32x256xf32> to vector<8x128xf32>
    %152 = tpu.concatenate %150, %151 in 0 : vector<8x128xf32>, vector<8x128xf32> -> vector<16x128xf32>
    %cst_35 = arith.constant dense<0.000000e+00> : vector<16x256xf32>
    %153 = tpu.matmul %140, %112, %cst_35 {dimension_numbers = #tpu.dot_dimension_numbers<[1], [0], [0], [1], [0, 0, 1, 1], [], []>} : vector<16x32xf32>, vector<32x256xf32>, vector<16x256xf32> -> vector<16x256xf32>
    %154 = vector.extract_strided_slice %153 {offsets = [0, 0], sizes = [8, 128], strides = [1, 1]} : vector<16x256xf32> to vector<8x128xf32>
    %155 = vector.extract_strided_slice %153 {offsets = [8, 128], sizes = [8, 128], strides = [1, 1]} : vector<16x256xf32> to vector<8x128xf32>
    %156 = tpu.concatenate %154, %155 in 0 : vector<8x128xf32>, vector<8x128xf32> -> vector<16x128xf32>
    %157 = arith.addf %152, %156 : vector<16x128xf32>
    %158 = arith.negf %157 : vector<16x128xf32>
    %159 = math.exp %158 : vector<16x128xf32>
    %cst_36 = arith.constant 1.000000e+00 : f32
    %160 = vector.broadcast %cst_36 : f32 to vector<16x128xf32>
    %161 = arith.addf %160, %159 : vector<16x128xf32>
    %162 = arith.divf %160, %161 : vector<16x128xf32>
    %163 = vector.extract_strided_slice %162 {offsets = [0, 0], sizes = [16, 32], strides = [1, 1]} : vector<16x128xf32> to vector<16x32xf32>
    %164 = vector.extract_strided_slice %162 {offsets = [0, 32], sizes = [16, 32], strides = [1, 1]} : vector<16x128xf32> to vector<16x32xf32>
    %165 = vector.extract_strided_slice %162 {offsets = [0, 64], sizes = [16, 32], strides = [1, 1]} : vector<16x128xf32> to vector<16x32xf32>
    %cst_37 = arith.constant 2.000000e+00 : f32
    %166 = vector.broadcast %cst_37 : f32 to vector<16x32xf32>
    %167 = arith.mulf %166, %165 : vector<16x32xf32>
    %cst_38 = arith.constant 1.000000e+00 : f32
    %168 = vector.broadcast %cst_38 : f32 to vector<16x32xf32>
    %169 = arith.subf %167, %168 : vector<16x32xf32>
    %170 = vector.extract_strided_slice %162 {offsets = [0, 96], sizes = [16, 32], strides = [1, 1]} : vector<16x128xf32> to vector<16x32xf32>
    %171 = arith.mulf %164, %138 : vector<16x32xf32>
    %172 = arith.mulf %163, %169 : vector<16x32xf32>
    %173 = arith.addf %171, %172 : vector<16x32xf32>
    %174 = math.tanh %173 : vector<16x32xf32>
    %175 = arith.mulf %170, %174 : vector<16x32xf32>
    %176 = vector.extract_strided_slice %175 {offsets = [0, 0], sizes = [8, 32], strides = [1, 1]} : vector<16x32xf32> to vector<8x32xf32>
    %177 = vector.extract_strided_slice %175 {offsets = [8, 0], sizes = [8, 32], strides = [1, 1]} : vector<16x32xf32> to vector<8x32xf32>
    %c64 = arith.constant 64 : index
    %c0_39 = arith.constant 0 : index
    %178 = vector.load %arg2[%c64, %c0_39] : memref<400x128xf32, #tpu.memory_space<vmem>>, vector<32x128xf32>
    %cst_40 = arith.constant dense<0.000000e+00> : vector<8x128xf32>
    %179 = tpu.matmul %176, %178, %cst_40 {dimension_numbers = #tpu.dot_dimension_numbers<[1], [0], [0], [1], [0, 0, 1, 1], [], []>} : vector<8x32xf32>, vector<32x128xf32>, vector<8x128xf32> -> vector<8x128xf32>
    %180 = arith.addf %149, %179 : vector<8x128xf32>
    %c160 = arith.constant 160 : index
    %c0_41 = arith.constant 0 : index
    %181 = vector.load %arg2[%c160, %c0_41] : memref<400x128xf32, #tpu.memory_space<vmem>>, vector<32x128xf32>
    %cst_42 = arith.constant dense<0.000000e+00> : vector<8x128xf32>
    %182 = tpu.matmul %177, %181, %cst_42 {dimension_numbers = #tpu.dot_dimension_numbers<[1], [0], [0], [1], [0, 0, 1, 1], [], []>} : vector<8x32xf32>, vector<32x128xf32>, vector<8x128xf32> -> vector<8x128xf32>
    %183 = arith.addf %180, %182 : vector<8x128xf32>
    %184 = vector.extract_strided_slice %122 {offsets = [16, 0], sizes = [8, 128], strides = [1, 1]} : vector<32x256xf32> to vector<8x128xf32>
    %185 = vector.extract_strided_slice %122 {offsets = [8, 128], sizes = [8, 128], strides = [1, 1]} : vector<32x256xf32> to vector<8x128xf32>
    %186 = tpu.concatenate %184, %185 in 0 : vector<8x128xf32>, vector<8x128xf32> -> vector<16x128xf32>
    %cst_43 = arith.constant dense<0.000000e+00> : vector<16x256xf32>
    %187 = tpu.matmul %175, %112, %cst_43 {dimension_numbers = #tpu.dot_dimension_numbers<[1], [0], [0], [1], [0, 0, 1, 1], [], []>} : vector<16x32xf32>, vector<32x256xf32>, vector<16x256xf32> -> vector<16x256xf32>
    %188 = vector.extract_strided_slice %187 {offsets = [0, 0], sizes = [8, 128], strides = [1, 1]} : vector<16x256xf32> to vector<8x128xf32>
    %189 = vector.extract_strided_slice %187 {offsets = [8, 128], sizes = [8, 128], strides = [1, 1]} : vector<16x256xf32> to vector<8x128xf32>
    %190 = tpu.concatenate %188, %189 in 0 : vector<8x128xf32>, vector<8x128xf32> -> vector<16x128xf32>
    %191 = arith.addf %186, %190 : vector<16x128xf32>
    %192 = arith.negf %191 : vector<16x128xf32>
    %193 = math.exp %192 : vector<16x128xf32>
    %cst_44 = arith.constant 1.000000e+00 : f32
    %194 = vector.broadcast %cst_44 : f32 to vector<16x128xf32>
    %195 = arith.addf %194, %193 : vector<16x128xf32>
    %196 = arith.divf %194, %195 : vector<16x128xf32>
    %197 = vector.extract_strided_slice %196 {offsets = [0, 0], sizes = [16, 32], strides = [1, 1]} : vector<16x128xf32> to vector<16x32xf32>
    %198 = vector.extract_strided_slice %196 {offsets = [0, 32], sizes = [16, 32], strides = [1, 1]} : vector<16x128xf32> to vector<16x32xf32>
    %199 = vector.extract_strided_slice %196 {offsets = [0, 64], sizes = [16, 32], strides = [1, 1]} : vector<16x128xf32> to vector<16x32xf32>
    %cst_45 = arith.constant 2.000000e+00 : f32
    %200 = vector.broadcast %cst_45 : f32 to vector<16x32xf32>
    %201 = arith.mulf %200, %199 : vector<16x32xf32>
    %cst_46 = arith.constant 1.000000e+00 : f32
    %202 = vector.broadcast %cst_46 : f32 to vector<16x32xf32>
    %203 = arith.subf %201, %202 : vector<16x32xf32>
    %204 = vector.extract_strided_slice %196 {offsets = [0, 96], sizes = [16, 32], strides = [1, 1]} : vector<16x128xf32> to vector<16x32xf32>
    %205 = arith.mulf %198, %173 : vector<16x32xf32>
    %206 = arith.mulf %197, %203 : vector<16x32xf32>
    %207 = arith.addf %205, %206 : vector<16x32xf32>
    %208 = math.tanh %207 : vector<16x32xf32>
    %209 = arith.mulf %204, %208 : vector<16x32xf32>
    %210 = vector.extract_strided_slice %209 {offsets = [0, 0], sizes = [8, 32], strides = [1, 1]} : vector<16x32xf32> to vector<8x32xf32>
    %211 = vector.extract_strided_slice %209 {offsets = [8, 0], sizes = [8, 32], strides = [1, 1]} : vector<16x32xf32> to vector<8x32xf32>
    %c128 = arith.constant 128 : index
    %c0_47 = arith.constant 0 : index
    %212 = vector.load %arg2[%c128, %c0_47] : memref<400x128xf32, #tpu.memory_space<vmem>>, vector<32x128xf32>
    %cst_48 = arith.constant dense<0.000000e+00> : vector<8x128xf32>
    %213 = tpu.matmul %210, %212, %cst_48 {dimension_numbers = #tpu.dot_dimension_numbers<[1], [0], [0], [1], [0, 0, 1, 1], [], []>} : vector<8x32xf32>, vector<32x128xf32>, vector<8x128xf32> -> vector<8x128xf32>
    %214 = arith.addf %183, %213 : vector<8x128xf32>
    %c96 = arith.constant 96 : index
    %c0_49 = arith.constant 0 : index
    %215 = vector.load %arg2[%c96, %c0_49] : memref<400x128xf32, #tpu.memory_space<vmem>>, vector<32x128xf32>
    %cst_50 = arith.constant dense<0.000000e+00> : vector<8x128xf32>
    %216 = tpu.matmul %211, %215, %cst_50 {dimension_numbers = #tpu.dot_dimension_numbers<[1], [0], [0], [1], [0, 0, 1, 1], [], []>} : vector<8x32xf32>, vector<32x128xf32>, vector<8x128xf32> -> vector<8x128xf32>
    %217 = arith.addf %214, %216 : vector<8x128xf32>
    %218 = vector.extract_strided_slice %122 {offsets = [24, 0], sizes = [8, 128], strides = [1, 1]} : vector<32x256xf32> to vector<8x128xf32>
    %219 = vector.extract_strided_slice %122 {offsets = [0, 128], sizes = [8, 128], strides = [1, 1]} : vector<32x256xf32> to vector<8x128xf32>
    %220 = tpu.concatenate %218, %219 in 0 : vector<8x128xf32>, vector<8x128xf32> -> vector<16x128xf32>
    %cst_51 = arith.constant dense<0.000000e+00> : vector<16x256xf32>
    %221 = tpu.matmul %209, %112, %cst_51 {dimension_numbers = #tpu.dot_dimension_numbers<[1], [0], [0], [1], [0, 0, 1, 1], [], []>} : vector<16x32xf32>, vector<32x256xf32>, vector<16x256xf32> -> vector<16x256xf32>
    %222 = vector.extract_strided_slice %221 {offsets = [0, 0], sizes = [8, 128], strides = [1, 1]} : vector<16x256xf32> to vector<8x128xf32>
    %223 = vector.extract_strided_slice %221 {offsets = [8, 128], sizes = [8, 128], strides = [1, 1]} : vector<16x256xf32> to vector<8x128xf32>
    %224 = tpu.concatenate %222, %223 in 0 : vector<8x128xf32>, vector<8x128xf32> -> vector<16x128xf32>
    %225 = arith.addf %220, %224 : vector<16x128xf32>
    %226 = arith.negf %225 : vector<16x128xf32>
    %227 = math.exp %226 : vector<16x128xf32>
    %cst_52 = arith.constant 1.000000e+00 : f32
    %228 = vector.broadcast %cst_52 : f32 to vector<16x128xf32>
    %229 = arith.addf %228, %227 : vector<16x128xf32>
    %230 = arith.divf %228, %229 : vector<16x128xf32>
    %231 = vector.extract_strided_slice %230 {offsets = [0, 0], sizes = [16, 32], strides = [1, 1]} : vector<16x128xf32> to vector<16x32xf32>
    %232 = vector.extract_strided_slice %230 {offsets = [0, 32], sizes = [16, 32], strides = [1, 1]} : vector<16x128xf32> to vector<16x32xf32>
    %233 = vector.extract_strided_slice %230 {offsets = [0, 64], sizes = [16, 32], strides = [1, 1]} : vector<16x128xf32> to vector<16x32xf32>
    %cst_53 = arith.constant 2.000000e+00 : f32
    %234 = vector.broadcast %cst_53 : f32 to vector<16x32xf32>
    %235 = arith.mulf %234, %233 : vector<16x32xf32>
    %cst_54 = arith.constant 1.000000e+00 : f32
    %236 = vector.broadcast %cst_54 : f32 to vector<16x32xf32>
    %237 = arith.subf %235, %236 : vector<16x32xf32>
    %238 = vector.extract_strided_slice %230 {offsets = [0, 96], sizes = [16, 32], strides = [1, 1]} : vector<16x128xf32> to vector<16x32xf32>
    %239 = arith.mulf %232, %207 : vector<16x32xf32>
    %240 = arith.mulf %231, %237 : vector<16x32xf32>
    %241 = arith.addf %239, %240 : vector<16x32xf32>
    %242 = math.tanh %241 : vector<16x32xf32>
    %243 = arith.mulf %238, %242 : vector<16x32xf32>
    %244 = vector.extract_strided_slice %243 {offsets = [0, 0], sizes = [8, 32], strides = [1, 1]} : vector<16x32xf32> to vector<8x32xf32>
    %245 = vector.extract_strided_slice %243 {offsets = [8, 0], sizes = [8, 32], strides = [1, 1]} : vector<16x32xf32> to vector<8x32xf32>
    %c192 = arith.constant 192 : index
    %c0_55 = arith.constant 0 : index
    %246 = vector.load %arg2[%c192, %c0_55] : memref<400x128xf32, #tpu.memory_space<vmem>>, vector<32x128xf32>
    %cst_56 = arith.constant dense<0.000000e+00> : vector<8x128xf32>
    %247 = tpu.matmul %244, %246, %cst_56 {dimension_numbers = #tpu.dot_dimension_numbers<[1], [0], [0], [1], [0, 0, 1, 1], [], []>} : vector<8x32xf32>, vector<32x128xf32>, vector<8x128xf32> -> vector<8x128xf32>
    %248 = arith.addf %217, %247 : vector<8x128xf32>
    %c32 = arith.constant 32 : index
    %c0_57 = arith.constant 0 : index
    %249 = vector.load %arg2[%c32, %c0_57] : memref<400x128xf32, #tpu.memory_space<vmem>>, vector<32x128xf32>
    %cst_58 = arith.constant dense<0.000000e+00> : vector<8x128xf32>
    %250 = tpu.matmul %245, %249, %cst_58 {dimension_numbers = #tpu.dot_dimension_numbers<[1], [0], [0], [1], [0, 0, 1, 1], [], []>} : vector<8x32xf32>, vector<32x128xf32>, vector<8x128xf32> -> vector<8x128xf32>
    %251 = arith.addf %248, %250 : vector<8x128xf32>
    %c264 = arith.constant 264 : index
    %c0_59 = arith.constant 0 : index
    %252 = vector.load %arg2[%c264, %c0_59] : memref<400x128xf32, #tpu.memory_space<vmem>>, vector<128x128xf32>
    %c392 = arith.constant 392 : index
    %c0_60 = arith.constant 0 : index
    %253 = vector.load %arg2[%c392, %c0_60] : memref<400x128xf32, #tpu.memory_space<vmem>>, vector<1x128xf32>
    %cst_61 = arith.constant dense<0.000000e+00> : vector<8x128xf32>
    %254 = tpu.matmul %251, %252, %cst_61 {dimension_numbers = #tpu.dot_dimension_numbers<[1], [0], [0], [1], [0, 0, 1, 1], [], []>} : vector<8x128xf32>, vector<128x128xf32>, vector<8x128xf32> -> vector<8x128xf32>
    %255 = vector.broadcast %253 : vector<1x128xf32> to vector<8x128xf32>
    %256 = arith.addf %254, %255 : vector<8x128xf32>
    %c0_62 = arith.constant 0 : index
    %c0_63 = arith.constant 0 : index
    %257 = vector.load %arg3[%c0_62, %c0_63] : memref<8x128xf32, #tpu.memory_space<vmem>>, vector<8x128xf32>
    tpu.vector_store %arg3[%c0_62, %c0_63], %256 {strides = array<i32>} : memref<8x128xf32, #tpu.memory_space<vmem>>, vector<8x128xf32>,
    return
  }
}

</mosaic_0001>

<bundles_post_ra>
// kernel: lstm_model_forward.1
= control target key start
LH: loop header
LB: loop body
LE: loop exit
PB: predicated region body
PF: predicated region fallthrough
CT: control target
= control target key end

     0   :  { %8 = vsyncpa [#allocation3], 0  ;;  %s2943_s0 = inlined_call_operand.vmem [shape: f32[32,16], index: 0, kind: input, shape index: {}]   ;;  %s2944_s1 = inlined_call_operand.hbm [shape: f32[160,256], index: 1, kind: input, shape index: {}]   ;;  %s2945_s2 = inlined_call_operand.hbm [shape: f32[400,128], index: 2, kind: input, shape index: {}]   ;;  %s2946_s3 = inlined_call_operand.vmem [shape: f32[8,128], index: 3, kind: output, shape index: {}]  }
   0x1   :  { %9 = vsyncpa [#allocation5], 0  ;;  %s2599_s12 = smov [#allocation2]   ;;  %s2551_s16 = scalar_lea.hbm %s2944_s1, 5120 }
   0x2   :  { %s17_s13 = sshll.u32 %s2599_s12, 4  ;;  %p2552_p0 = scmp.ne.s32.totalorder %s2944_s1, %s2551_s16  ;;  %s18_s13 = int_to_ptr.vmem [resolvable:$true] %s17_s13 }
   0x3   :  { %p2555_p1 = scmp.lt.u32.totalorder %s2551_s16, %s2944_s1 }
   0x5   :  { %p2557_p2 = pnand %p2555_p1, %p2552_p0 }
   0x7   :  { %2560 = shalt.err (!%p2557_p2)
}
   0x8   :  { %s2561_s21 = scalar_lea.vmem %s18_s13, 5120  ;;  %p2566_p4 = scmp.lt.s32.totalorder %s18_s13, %s18_s13 }
   0x9   :  { %p2562_p3 = scmp.ne.s32.totalorder %s18_s13, %s2561_s21  ;;  %p2567_p5 = scmp.lt.s32.totalorder %s2561_s21, %s2561_s21 }
   0xb   :  { %p2568_p6 = por %p2567_p5, %p2566_p4 }
   0xd   :  { %p2569_p7 = pnand %p2568_p6, %p2562_p3 }
   0xf   :  { %2572 = shalt.err (!%p2569_p7)
}
  0x10   :  { %s2600_s22 = smov 256   ;;  %s2601_s23 = smov 16  }
  0x11   :  { %23 = dma.hbm_to_vmem [thread:$0]  %s2944_s1, 5120, %s18_s13, [#allocation3], %s2600_s22, %s2600_s22, %s2601_s23  }
  0x12   :  { %s2602_s26 = smov [#allocation4]   ;;  %s2573_s30 = scalar_lea.hbm %s2945_s2, 6400 }
  0x13   :  { %s29_s27 = sshll.u32 %s2602_s26, 4  ;;  %p2574_p8 = scmp.ne.s32.totalorder %s2945_s2, %s2573_s30  ;;  %s30_s27 = int_to_ptr.vmem [resolvable:$true] %s29_s27 }
  0x14   :  { %p2577_p9 = scmp.lt.u32.totalorder %s2573_s30, %s2945_s2 }
  0x16   :  { %p2579_p10 = pnand %p2577_p9, %p2574_p8 }
  0x18   :  { %2582 = shalt.err (!%p2579_p10)
}
  0x19   :  { %s2583_s8 = scalar_lea.vmem %s30_s27, 6400  ;;  %p2588_p12 = scmp.lt.s32.totalorder %s30_s27, %s30_s27 }
  0x1a   :  { %p2584_p11 = scmp.ne.s32.totalorder %s30_s27, %s2583_s8  ;;  %p2589_p13 = scmp.lt.s32.totalorder %s2583_s8, %s2583_s8 }
  0x1c   :  { %p2590_p0 = por %p2589_p13, %p2588_p12 }
  0x1e   :  { %p2591_p1 = pnand %p2590_p0, %p2584_p11 }
  0x20   :  { %2594 = shalt.err (!%p2591_p1)
}
  0x21   :  { %s2603_s1 = smov 128   ;;  %s2604_s9 = smov 8  }
  0x22   :  { %35 = dma.hbm_to_vmem [thread:$0]  %s2945_s2, 6400, %s30_s27, [#allocation5], %s2603_s1, %s2603_s1, %s2604_s9  }
  0x23   :  { %2595 = dma.done.wait [#allocation3], 5120  }
  0x24   :  { %2596 = vsyncadd [#allocation3], 4294962176 }
  0x25   :  { %2597 = dma.done.wait [#allocation5], 6400  }
  0x26   :  { %2598 = vsyncadd [#allocation5], 4294960896  ;;  %v2605_v0 = vmov 0.0   ;;  %v58_v1 = vld [vmem:[#allocation2 + $0x8] sm:$0xff]  ;;  %v60_v2 = vld [vmem:[#allocation2 + $0x18] sm:$0xff]  ;;  %vm72_vm0 = vcmask 130048   ;;  %v62_v11 = vlaneseq }
  0x27   :  { %149 = vmatprep.mubr.f32.mxu0 %v2605_v0  ;;  %287 = vmatprep.mubr.f32.mxu1 %v2605_v0  ;;  %v57_v3 = vld [vmem:[#allocation2] sm:$0xff]  ;;  %v2280_v4 = vpack.c.bf16 %v60_v2, %v58_v1  ;;  %v59_v5 = vld [vmem:[#allocation2 + $0x10] sm:$0xff]  ;;  %v54_v8 = vld [vmem:[%s2943_s0 + $0x8] sm:$0xff]  ;;  %s2607_s19 = smov 96   ;;  %s2608_s20 = smov 32   ;;  %vm218_vm1 = vcmask 261120  }
  0x28   :  { %v2282_v6 = vpack.c.bf16 %v59_v5, %v57_v3  ;;  %v53_v7 = vld [vmem:[%s2943_s0] sm:$0xff]  ;;  %v55_v9 = vld [vmem:[%s2943_s0 + $0x10] sm:$0xff]  ;;  %v56_v10 = vld [vmem:[%s2943_s0 + $0x18] sm:$0xff]  ;;  %v2673_v12 = vshrl.u32 %v62_v11, 7  ;;  %s2606_s0 = smov 64   ;;  %vm2610_vm2 = vmmov 0  }
  0x29   :  { %2281 = vmatprep.subr.bf16.mxu0 %v2280_v4  ;;  %v52_v14 = vld [vmem:[#allocation2 + $0x60] ss:$8 sm:$0x3]  ;;  %v46_v52 = vld [vmem:[#allocation2 + $0x38] sm:$0xff]  ;;  %v45_v55 = vld [vmem:[#allocation2 + $0x30] sm:$0xff] }
  0x2a   :  { %2283 = vmatpush1.bf16.msra.mxu0 %v2282_v6  ;;  %v64_v13 = vsub.s32 0, %v2673_v12  ;;  %v68_v15 = vsub.s32 1, %v2673_v12  ;;  %v44_v51 = vld [vmem:[#allocation2 + $0x28] sm:$0xff]  ;;  %v43_v53 = vld [vmem:[#allocation2 + $0x20] sm:$0xff]  ;;  %v50_v57 = vld [vmem:[#allocation2 + $0x58] sm:$0xff] }
  0x2b   :  { %v2284_v54 = vpack.c.bf16 %v46_v52, %v44_v51  ;;  %v48_v56 = vld [vmem:[#allocation2 + $0x48] sm:$0xff]  ;;  %v2286_v58 = vpack.c.bf16 %v45_v55, %v43_v53  ;;  %v47_v60 = vld [vmem:[#allocation2 + $0x40] sm:$0xff]  ;;  %v49_v61 = vld [vmem:[#allocation2 + $0x50] sm:$0xff] }
  0x2c   :  { %v65_v16 = vrot.slane %v52_v14, %v64_v13  ;;  %v69_v17 = vrot.slane %v52_v14, %v68_v15  ;;  %v2288_v59 = vpack.c.bf16 %v50_v57, %v48_v56  ;;  %v2290_v62 = vpack.c.bf16 %v49_v61, %v47_v60 }
  0x2d   :  { %2034 = vmatmul.mubr.msk.f32.vlgmr.msra.gmra.mrb[0].mxu0 %vm72_vm0, %v53_v7  ;;  %2285 = vmatprep.subr.bf16.mxu1 %v2284_v54 }
  0x2e   :  { %155 = vmatprep.mubr.f32.mxu0 %v2605_v0  ;;  %2301 = vmatprep.subr.bf16.mxu0 %v2284_v54 }
  0x2f   :  { %2287 = vmatpush1.bf16.msra.mxu1 %v2286_v58  ;;  %2303 = vmatpush1.bf16.msra.mxu0 %v2286_v58 }
  0x30   :  { %2289 = vmatprep.subr.bf16.mxu1 %v2288_v59  ;;  %2305 = vmatprep.subr.bf16.mxu0 %v2288_v59 }
  0x31   :  { %2035 = vmatmul.mubr.msk.f32.gmra.mrb[2].mxu0 %vm72_vm0, %v54_v8 }
  0x32   :  { %161 = vmatprep.mubr.f32.mxu0 %v2605_v0 }
  0x33   :  { %2291 = vmatpush1.bf16.msra.mxu1 %v2290_v62  ;;  %2307 = vmatpush1.bf16.msra.mxu0 %v2290_v62 }
  0x34   :  { %2293 = vmatprep.subr.bf16.mxu1 %v2284_v54 }
  0x35   :  { %2036 = vmatmul.mubr.msk.f32.gmra.mrb[4].mxu0 %vm72_vm0, %v55_v9 }
  0x36   :  { %167 = vmatprep.mubr.f32.mxu0 %v2605_v0 }
  0x39   :  { %2037 = vmatmul.mubr.msk.f32.gmra.mrb[6].mxu0 %vm72_vm0, %v56_v10 }
  0x3a   :  { %569 = vmatprep.mubr.f32.mxu0 %v2605_v0 }
 0x100   :  { %v151_v18 = vpop.f32.mrb[0].mxu0 }
 0x101   :  { %v152_v19 = vadd.f32 %v151_v18, %v65_v16  ;;  %v153_v20 = vpop.f32.mrb[1].mxu0 }
 0x102   :  { %v2681_v21 = vadd.f32 %v153_v20, %v69_v17 }
 0x103   :  { %v2038_v22 = vmul.f32 -1.442695, %v152_v19 }
 0x104   :  { %v157_v23 = vpop.f32.mrb[2].mxu0 }
 0x105   :  { %2455 = vpow2.f32 %v2038_v22  ;;  %v2683_v24 = vadd.f32 %v157_v23, %v65_v16  ;;  %v159_v25 = vpop.f32.mrb[3].mxu0 }
 0x106   :  { %v2685_v26 = vadd.f32 %v159_v25, %v69_v17 }
 0x108   :  { %v163_v27 = vpop.f32.mrb[4].mxu0 }
 0x109   :  { %v2687_v28 = vadd.f32 %v163_v27, %v65_v16  ;;  %v165_v29 = vpop.f32.mrb[5].mxu0 }
 0x10a   :  { %v2689_v30 = vadd.f32 %v165_v29, %v69_v17 }
 0x10c   :  { %v169_v31 = vpop.f32.mrb[6].mxu0 }
 0x10d   :  { %v2691_v32 = vadd.f32 %v169_v31, %v65_v16  ;;  %v171_v33 = vpop.f32.mrb[7].mxu0 }
 0x10e   :  { %v172_v34 = vadd.f32 %v171_v33, %v69_v17 }
 0x10f   :  { %v2456_v35 = vpop.eup %2455 }
 0x110   :  { %v180_v36 = vadd.f32 1.0, %v2456_v35  ;;  %v2039_v37 = vmul.f32 -1.442695, %v172_v34 }
 0x112   :  { %2457 = vrcp.f32 %v180_v36 }
 0x113   :  { %2459 = vpow2.f32 %v2039_v37 }
 0x11c   :  { %v2458_v38 = vpop.eup %2457 }
 0x11d   :  { %v2460_v39 = vpop.eup %2459  ;;  %v186_v40 = vmul.f32 2.0, %v2458_v38 }
 0x11e   :  { %v181_v41 = vadd.f32 1.0, %v2460_v39 }
 0x11f   :  { %v2040_v42 = vadd.f32 -1.0, %v186_v40 }
 0x120   :  { %2461 = vrcp.f32 %v181_v41 }
 0x121   :  { %192 = vrot.lane.b32.xlu0 %v2040_v42, %s2606_s0 }
 0x12a   :  { %v2462_v43 = vpop.eup %2461 }
 0x12b   :  { %v187_v44 = vmul.f32 2.0, %v2462_v43 }
 0x12d   :  { %v2041_v45 = vadd.f32 -1.0, %v187_v44 }
 0x12f   :  { %194 = vrot.lane.b32.xlu0 %v2041_v45, %s2606_s0 }
 0x193   :  { %v193_v46 = vpop.permute.xlu0 %192 }
 0x194   :  { %v2695_v47 = vmul.f32 %v2458_v38, %v193_v46 }
 0x196   :  { %2463 = vtanh.f32 %v2695_v47 }
 0x1a0   :  { %v2464_v48 = vpop.eup %2463 }
 0x1a1   :  { %v195_v49 = vpop.permute.xlu0 %194  ;;  %204 = vrot.lane.b32.xlu1 %v2464_v48, %s2607_s19 }
 0x1a2   :  { %v199_v50 = vmul.f32 %v2462_v43, %v195_v49 }
 0x1a4   :  { %2465 = vtanh.f32 %v199_v50 }
 0x1ae   :  { %v2466_v63 = vpop.eup %2465 }
 0x1af   :  { %206 = vrot.lane.b32.xlu1 %v2466_v63, %s2607_s19 }
 0x213   :  { %v205_v1 = vpop.permute.xlu1 %204 }
 0x214   :  { %v210_v2 = vmul.f32 %v2458_v38, %v205_v1 }
 0x216   :  { %214 = vrot.lane.b32.xlu0 %v210_v2, %s2608_s20 }
 0x221   :  { %v207_v3 = vpop.permute.xlu1 %206 }
 0x222   :  { %v211_v4 = vmul.f32 %v2462_v43, %v207_v3 }
 0x224   :  { %216 = vrot.lane.b32.xlu1 %v211_v4, %s2608_s20 }
 0x288   :  { %v2702_v5 = vpop.permute.xlu0 %214 }
 0x289   :  { %2042 = vmatmul.mubr.msk.f32.vlgmr.msra.gmra.mrb[0].mxu1 %vm218_vm1, %v2702_v5 }
 0x28a   :  { %292 = vmatprep.mubr.f32.mxu1 %v2605_v0  ;;  %2295 = vmatpush1.bf16.msra.mxu1 %v2286_v58 }
 0x28b   :  { %2297 = vmatprep.subr.bf16.mxu1 %v2288_v59 }
 0x28e   :  { %2299 = vmatpush1.bf16.msra.mxu1 %v2290_v62 }
 0x296   :  { %v2707_v6 = vpop.permute.xlu1 %216 }
 0x297   :  { %2043 = vmatmul.mubr.msk.f32.gmra.mrb[2].mxu1 %vm218_vm1, %v2707_v6 }
 0x298   :  { %432 = vmatprep.mubr.f32.mxu1 %v2605_v0 }
 0x35c   :  { %v289_v7 = vpop.f32.mrb[0].mxu1 }
 0x35d   :  { %v298_v8 = vadd.f32 %v289_v7, %v2683_v24  ;;  %v291_v9 = vpop.f32.mrb[1].mxu1 }
 0x35f   :  { %v2044_v10 = vmul.f32 -1.442695, %v298_v8 }
 0x361   :  { %2467 = vpow2.f32 %v2044_v10 }
 0x36a   :  { %v294_v11 = vpop.f32.mrb[2].mxu1 }
 0x36b   :  { %v2468_v14 = vpop.eup %2467  ;;  %v295_v16 = vpop.f32.mrb[3].mxu1 }
 0x36c   :  { %v306_v17 = vadd.f32 1.0, %v2468_v14  ;;  %v299_v18 = vadd.f32 %v295_v16, %v2689_v30 }
 0x36e   :  { %2469 = vrcp.f32 %v306_v17  ;;  %v2045_v19 = vmul.f32 -1.442695, %v299_v18 }
 0x370   :  { %2471 = vpow2.f32 %v2045_v19 }
 0x378   :  { %v2470_v20 = vpop.eup %2469 }
 0x379   :  { %v312_v22 = vmul.f32 2.0, %v2470_v20 }
 0x37a   :  { %v2472_v23 = vpop.eup %2471 }
 0x37b   :  { %v307_v25 = vadd.f32 1.0, %v2472_v23  ;;  %v2046_v27 = vadd.f32 -1.0, %v312_v22 }
 0x37d   :  { %2473 = vrcp.f32 %v307_v25  ;;  %328 = vrot.lane.b32.xlu0 %v2046_v27, %s2606_s0 }
 0x381   :  { %318 = vrot.lane.b32.xlu0 %v2695_v47, %s2608_s20 }
 0x385   :  { %320 = vrot.lane.b32.xlu0 %v199_v50, %s2608_s20 }
 0x387   :  { %v2474_v24 = vpop.eup %2473 }
 0x388   :  { %v313_v29 = vmul.f32 2.0, %v2474_v24 }
 0x38a   :  { %v2047_v31 = vadd.f32 -1.0, %v313_v29 }
 0x38c   :  { %330 = vrot.lane.b32.xlu1 %v2047_v31, %s2606_s0 }
 0x3ef   :  { %v329_v30 = vpop.permute.xlu0 %328 }
 0x3f0   :  { %v334_v33 = vmul.f32 %v2470_v20, %v329_v30 }
 0x3f2   :  { %338 = vrot.lane.b32.xlu1 %v334_v33, %s2608_s20 }
 0x3f3   :  { %v319_v36 = vpop.permute.xlu0 %318 }
 0x3f4   :  { %v324_v37 = vmul.f32 %v2470_v20, %v319_v36 }
 0x3f7   :  { %v321_v40 = vpop.permute.xlu0 %320 }
 0x3f8   :  { %v325_v42 = vmul.f32 %v2474_v24, %v321_v40 }
 0x3fe   :  { %v331_v34 = vpop.permute.xlu1 %330 }
 0x3ff   :  { %v335_v35 = vmul.f32 %v2474_v24, %v331_v34 }
 0x401   :  { %340 = vrot.lane.b32.xlu1 %v335_v35, %s2608_s20 }
 0x464   :  { %v339_v38 = vpop.permute.xlu1 %338 }
 0x465   :  { %v344_v39 = vadd.f32 %v339_v38, %v324_v37 }
 0x467   :  { %2475 = vtanh.f32 %v344_v39 }
 0x471   :  { %v2476_v41 = vpop.eup %2475 }
 0x472   :  { %350 = vrot.lane.b32.xlu0 %v2476_v41, %s2606_s0 }
 0x473   :  { %v341_v43 = vpop.permute.xlu1 %340 }
 0x474   :  { %v345_v44 = vadd.f32 %v341_v43, %v325_v42 }
 0x476   :  { %2477 = vtanh.f32 %v345_v44 }
 0x480   :  { %v2478_v45 = vpop.eup %2477 }
 0x481   :  { %352 = vrot.lane.b32.xlu1 %v2478_v45, %s2606_s0 }
 0x4e4   :  { %v351_v46 = vpop.permute.xlu0 %350 }
 0x4e5   :  { %v356_v47 = vmul.f32 %v2470_v20, %v351_v46 }
 0x4e7   :  { %360 = vrot.lane.b32.xlu0 %v356_v47, %s2608_s20 }
 0x4f3   :  { %v353_v48 = vpop.permute.xlu1 %352 }
 0x4f4   :  { %v357_v49 = vmul.f32 %v2474_v24, %v353_v48 }
 0x4f6   :  { %362 = vrot.lane.b32.xlu1 %v357_v49, %s2608_s20 }
 0x559   :  { %v2725_v50 = vpop.permute.xlu0 %360 }
 0x55a   :  { %2048 = vmatmul.mubr.msk.f32.vlgmr.msra.gmra.mrb[4].mxu1 %vm218_vm1, %v2725_v50 }
 0x55b   :  { %437 = vmatprep.mubr.f32.mxu1 %v2605_v0 }
 0x568   :  { %v2730_v51 = vpop.permute.xlu1 %362 }
 0x569   :  { %2049 = vmatmul.mubr.msk.f32.gmra.mrb[6].mxu1 %vm218_vm1, %v2730_v51 }
 0x56a   :  { %727 = vmatprep.mubr.f32.mxu1 %v2605_v0 }
 0x62d   :  { %v434_v52 = vpop.f32.mrb[4].mxu1 }
 0x62e   :  { %v443_v53 = vadd.f32 %v434_v52, %v2687_v28  ;;  %v436_v54 = vpop.f32.mrb[5].mxu1 }
 0x630   :  { %v2050_v55 = vmul.f32 -1.442695, %v443_v53 }
 0x632   :  { %2479 = vpow2.f32 %v2050_v55 }
 0x63c   :  { %v2480_v56 = vpop.eup %2479  ;;  %v439_v57 = vpop.f32.mrb[6].mxu1 }
 0x63d   :  { %v451_v58 = vadd.f32 1.0, %v2480_v56  ;;  %v440_v59 = vpop.f32.mrb[7].mxu1 }
 0x63e   :  { %v444_v60 = vadd.f32 %v440_v59, %v2685_v26 }
 0x63f   :  { %2481 = vrcp.f32 %v451_v58 }
 0x640   :  { %v2051_v61 = vmul.f32 -1.442695, %v444_v60 }
 0x642   :  { %2483 = vpow2.f32 %v2051_v61 }
 0x649   :  { %v2482_v62 = vpop.eup %2481 }
 0x64a   :  { %v457_v63 = vmul.f32 2.0, %v2482_v62  ;;  %v461_v11 = vmul.f32 %v2482_v62, %v344_v39 }
 0x64c   :  { %v2484_v1 = vpop.eup %2483  ;;  %v2052_v2 = vadd.f32 -1.0, %v457_v63  ;;  %v653_v63 = vld [vmem:[#allocation2 + $0xc8] sm:$0xff] }
 0x64d   :  { %v452_v3 = vadd.f32 1.0, %v2484_v1  ;;  %v650_v1 = vld [vmem:[#allocation2 + $0xb0] sm:$0xff] }
 0x64e   :  { %465 = vrot.lane.b32.xlu0 %v2052_v2, %s2606_s0 }
 0x64f   :  { %2485 = vrcp.f32 %v452_v3  ;;  %v652_v3 = vld [vmem:[#allocation2 + $0xc0] sm:$0xff] }
 0x659   :  { %v2486_v28 = vpop.eup %2485 }
 0x65a   :  { %v458_v4 = vmul.f32 2.0, %v2486_v28  ;;  %v462_v18 = vmul.f32 %v2486_v28, %v345_v44 }
 0x65c   :  { %v2053_v7 = vadd.f32 -1.0, %v458_v4  ;;  %v657_v4 = vld [vmem:[#allocation2 + $0xe8] sm:$0xff] }
 0x65e   :  { %467 = vrot.lane.b32.xlu1 %v2053_v7, %s2606_s0  ;;  %v2310_v7 = vpack.c.bf16 %v652_v3, %v650_v1  ;;  %v904_v3 = vld [vmem:[#allocation4 + $0x8] sm:$0xff] }
 0x6c0   :  { %v466_v8 = vpop.permute.xlu0 %465 }
 0x6c1   :  { %v471_v9 = vmul.f32 %v2482_v62, %v466_v8 }
 0x6c3   :  { %475 = vrot.lane.b32.xlu0 %v471_v9, %s2608_s20  ;;  %v654_v9 = vld [vmem:[#allocation2 + $0xd0] sm:$0xff] }
 0x6d0   :  { %v468_v26 = vpop.permute.xlu1 %467 }
 0x6d1   :  { %v472_v10 = vmul.f32 %v2486_v28, %v468_v26  ;;  %v656_v26 = vld [vmem:[#allocation2 + $0xe0] sm:$0xff] }
 0x6d3   :  { %477 = vrot.lane.b32.xlu1 %v472_v10, %s2608_s20  ;;  %v643_v10 = vld [vmem:[#allocation2 + $0x78] sm:$0xff] }
 0x735   :  { %v476_v14 = vpop.permute.xlu0 %475 }
 0x736   :  { %v481_v16 = vadd.f32 %v476_v14, %v461_v11  ;;  %v645_v11 = vld [vmem:[#allocation2 + $0x88] sm:$0xff]  ;;  %v2314_v14 = vpack.c.bf16 %v656_v26, %v654_v9 }
 0x738   :  { %2487 = vtanh.f32 %v481_v16 }
 0x742   :  { %v2488_v17 = vpop.eup %2487 }
 0x743   :  { %487 = vrot.lane.b32.xlu0 %v2488_v17, %s2606_s0 }
 0x745   :  { %v478_v19 = vpop.permute.xlu1 %477 }
 0x746   :  { %v482_v20 = vadd.f32 %v478_v19, %v462_v18 }
 0x748   :  { %2489 = vtanh.f32 %v482_v20 }
 0x752   :  { %v2490_v22 = vpop.eup %2489 }
 0x753   :  { %489 = vrot.lane.b32.xlu1 %v2490_v22, %s2606_s0  ;;  %v642_v22 = vld [vmem:[#allocation2 + $0x70] sm:$0xff] }
 0x7b5   :  { %v488_v23 = vpop.permute.xlu0 %487 }
 0x7b6   :  { %v493_v25 = vmul.f32 %v2482_v62, %v488_v23  ;;  %v651_v62 = vld [vmem:[#allocation2 + $0xb8] sm:$0xff]  ;;  %v644_v23 = vld [vmem:[#allocation2 + $0x80] sm:$0xff] }
 0x7b7   :  { %v2308_v2 = vpack.c.bf16 %v653_v63, %v651_v62 }
 0x7b8   :  { %497 = vrot.lane.b32.xlu0 %v493_v25, %s2608_s20  ;;  %v647_v25 = vld [vmem:[#allocation2 + $0x98] sm:$0xff] }
 0x7b9   :  { %2309 = vmatprep.subr.bf16.mxu1 %v2308_v2  ;;  %v903_v2 = vld [vmem:[#allocation4] sm:$0xff] }
 0x7ba   :  { %2311 = vmatpush1.bf16.msra.mxu1 %v2310_v7  ;;  %v2325_v7 = vpack.c.bf16 %v904_v3, %v903_v2 }
 0x7c5   :  { %v490_v27 = vpop.permute.xlu1 %489 }
 0x7c6   :  { %v494_v24 = vmul.f32 %v2486_v28, %v490_v27  ;;  %v655_v28 = vld [vmem:[#allocation2 + $0xd8] sm:$0xff]  ;;  %v649_v27 = vld [vmem:[#allocation2 + $0xa8] sm:$0xff] }
 0x7c7   :  { %v2312_v8 = vpack.c.bf16 %v657_v4, %v655_v28  ;;  %v905_v28 = vld [vmem:[#allocation4 + $0x10] sm:$0xff]  ;;  %v2609_v4 = vmov 0.0|0.0  }
 0x7c8   :  { %499 = vrot.lane.b32.xlu1 %v494_v24, %s2608_s20  ;;  %v2318_v24 = vpack.c.bf16 %v644_v23, %v642_v22  ;;  %2324 = vmatprep.subr.bf16.mxu0 %v2609_v4  ;;  %v637_v22 = vld [vmem:[#allocation2 + $0x118] sm:$0xff]  ;;  %v639_v23 = vld [vmem:[#allocation2 + $0x128] sm:$0xff] }
 0x7c9   :  { %2313 = vmatprep.subr.bf16.mxu1 %v2312_v8  ;;  %v906_v8 = vld [vmem:[#allocation4 + $0x18] sm:$0xff] }
 0x7ca   :  { %2315 = vmatpush1.bf16.msra.mxu1 %v2314_v14  ;;  %v2328_v9 = vpack.c.bf16 %v906_v8, %v905_v28  ;;  %v1203_v8 = vld [vmem:[#allocation4 + $0x48] sm:$0xff] }
 0x82a   :  { %v2745_v29 = vpop.permute.xlu0 %497 }
 0x82b   :  { %2054 = vmatmul.mubr.msk.f32.vlgmr.msra.gmra.mrb[8].mxu0 %vm218_vm1, %v2745_v29 }
 0x82c   :  { %574 = vmatprep.mubr.f32.mxu0 %v2605_v0  ;;  %2326 = vmatpush3.bf16.msra.mxu0 %v2325_v7 }
 0x82d   :  { %2327 = vmatprep.subr.bf16.mxu0 %v2609_v4 }
 0x830   :  { %2329 = vmatpush3.bf16.msra.mxu0 %v2328_v9  ;;  %v1204_v9 = vld [vmem:[#allocation4 + $0x50] sm:$0xff] }
 0x831   :  { %2330 = vmatprep.subr.bf16.mxu0 %v2609_v4 }
 0x83a   :  { %v2750_v31 = vpop.permute.xlu1 %499 }
 0x83b   :  { %2055 = vmatmul.mubr.msk.f32.gmra.mrb[10].mxu0 %vm218_vm1, %v2750_v31 }
 0x83c   :  { %2165 = vmatprep.mubr.msk.f32.mxu0 %vm2610_vm2, %v2605_v0 }
 0x8fe   :  { %v571_v30 = vpop.f32.mrb[8].mxu0 }
 0x8ff   :  { %v580_v33 = vadd.f32 %v571_v30, %v2691_v32  ;;  %v573_v34 = vpop.f32.mrb[9].mxu0  ;;  %v2320_v30 = vpack.c.bf16 %v649_v27, %v647_v25  ;;  %v2821_v25 = vpack.c.bf16 %v639_v23, %v637_v22  ;;  %v636_v27 = vld [vmem:[#allocation2 + $0x110] sm:$0xff]  ;;  %v1282_v23 = vld [vmem:[#allocation4 + $0xa0] sm:$0xff] }
 0x900   :  { %v648_v34 = vld [vmem:[#allocation2 + $0xa0] sm:$0xff] }
 0x901   :  { %v2056_v35 = vmul.f32 -1.442695, %v580_v33  ;;  %v646_v33 = vld [vmem:[#allocation2 + $0x90] sm:$0xff] }
 0x903   :  { %2491 = vpow2.f32 %v2056_v35 }
 0x90d   :  { %v2492_v36 = vpop.eup %2491 }
 0x90e   :  { %v588_v37 = vadd.f32 1.0, %v2492_v36  ;;  %v576_v38 = vpop.f32.mrb[10].mxu0  ;;  %v2322_v36 = vpack.c.bf16 %v648_v34, %v646_v33 }
 0x90f   :  { %v577_v39 = vpop.f32.mrb[11].mxu0 }
 0x910   :  { %2493 = vrcp.f32 %v588_v37  ;;  %v581_v40 = vadd.f32 %v577_v39, %v2681_v21 }
 0x912   :  { %v2057_v41 = vmul.f32 -1.442695, %v581_v40 }
 0x914   :  { %2495 = vpow2.f32 %v2057_v41 }
 0x91a   :  { %v2494_v42 = vpop.eup %2493 }
 0x91b   :  { %v594_v43 = vmul.f32 2.0, %v2494_v42  ;;  %v598_v54 = vmul.f32 %v2494_v42, %v481_v16  ;;  %v2316_v16 = vpack.c.bf16 %v645_v11, %v643_v10  ;;  %v633_v10 = vld [vmem:[#allocation2 + $0xf8] sm:$0xff]  ;;  %v635_v11 = vld [vmem:[#allocation2 + $0x108] sm:$0xff] }
 0x91c   :  { %v2336_v14 = vpack.c.bf16 %v635_v11, %v633_v10  ;;  %v1205_v10 = vld [vmem:[#allocation4 + $0x58] sm:$0xff] }
 0x91d   :  { %v2058_v44 = vadd.f32 -1.0, %v594_v43  ;;  %2317 = vmatprep.subr.bf16.mxu1 %v2316_v16  ;;  %v2348_v11 = vpack.c.bf16 %v1205_v10, %v1204_v9  ;;  %v1572_v10 = vld [vmem:[#allocation4 + $0x78] sm:$0xff] }
 0x91e   :  { %v2496_v45 = vpop.eup %2495 }
 0x91f   :  { %v589_v46 = vadd.f32 1.0, %v2496_v45  ;;  %602 = vrot.lane.b32.xlu1 %v2058_v44, %s2606_s0 }
 0x921   :  { %2497 = vrcp.f32 %v589_v46 }
 0x92b   :  { %v2498_v32 = vpop.eup %2497 }
 0x92c   :  { %v595_v47 = vmul.f32 2.0, %v2498_v32  ;;  %v599_v58 = vmul.f32 %v2498_v32, %v482_v20 }
 0x92e   :  { %v2059_v48 = vadd.f32 -1.0, %v595_v47 }
 0x930   :  { %604 = vrot.lane.b32.xlu0 %v2059_v48, %s2606_s0 }
 0x991   :  { %v603_v49 = vpop.permute.xlu1 %602 }
 0x992   :  { %v608_v52 = vmul.f32 %v2494_v42, %v603_v49 }
 0x994   :  { %612 = vrot.lane.b32.xlu1 %v608_v52, %s2608_s20 }
 0x9a2   :  { %v605_v21 = vpop.permute.xlu0 %604 }
 0x9a3   :  { %v609_v53 = vmul.f32 %v2498_v32, %v605_v21 }
 0x9a5   :  { %614 = vrot.lane.b32.xlu0 %v609_v53, %s2608_s20 }
 0xa06   :  { %v613_v55 = vpop.permute.xlu1 %612 }
 0xa07   :  { %v618_v56 = vadd.f32 %v613_v55, %v598_v54 }
 0xa09   :  { %2499 = vtanh.f32 %v618_v56 }
 0xa13   :  { %v2500_v57 = vpop.eup %2499 }
 0xa14   :  { %624 = vrot.lane.b32.xlu1 %v2500_v57, %s2606_s0 }
 0xa17   :  { %v615_v59 = vpop.permute.xlu0 %614 }
 0xa18   :  { %v619_v60 = vadd.f32 %v615_v59, %v599_v58 }
 0xa1a   :  { %2501 = vtanh.f32 %v619_v60 }
 0xa24   :  { %v2502_v61 = vpop.eup %2501 }
 0xa25   :  { %626 = vrot.lane.b32.xlu0 %v2502_v61, %s2606_s0 }
 0xa86   :  { %v625_v17 = vpop.permute.xlu1 %624 }
 0xa87   :  { %v630_v18 = vmul.f32 %v2494_v42, %v625_v17 }
 0xa89   :  { %753 = vrot.lane.b32.xlu1 %v630_v18, %s2608_s20  ;;  %v632_v18 = vld [vmem:[#allocation2 + $0xf0] sm:$0xff] }
 0xa97   :  { %v627_v19 = vpop.permute.xlu0 %626 }
 0xa98   :  { %v631_v20 = vmul.f32 %v2498_v32, %v627_v19  ;;  %v634_v19 = vld [vmem:[#allocation2 + $0x100] sm:$0xff] }
 0xa9a   :  { %659 = vrot.lane.b32.xlu0 %v631_v20, %s2608_s20  ;;  %v2817_v20 = vpack.c.bf16 %v634_v19, %v632_v18 }
 0xb0c   :  { %v660_v35 = vpop.permute.xlu0 %659 }
 0xb0d   :  { %2060 = vmatmul.mubr.msk.f32.vlgmr.msra.gmra.mrb[8].mxu1 %vm218_vm1, %v660_v35  ;;  %v987_v35 = vld [vmem:[#allocation4 + $0xe0] sm:$0xff] }
 0xb0e   :  { %2319 = vmatpush1.bf16.msra.mxu1 %v2318_v24  ;;  %733 = vmatprep.mubr.f32.mxu1 %v2605_v0  ;;  %v638_v24 = vld [vmem:[#allocation2 + $0x120] sm:$0xff] }
 0xb0f   :  { %2321 = vmatprep.subr.bf16.mxu1 %v2320_v30  ;;  %v2823_v30 = vpack.c.bf16 %v638_v24, %v636_v27  ;;  %v1283_v27 = vld [vmem:[#allocation4 + $0xa8] sm:$0xff] }
 0xb10   :  { %v2351_v24 = vpack.c.bf16 %v1283_v27, %v1282_v23 }
 0xb11   :  { %2061 = vmatmul.mubr.msk.f32.gmra.mrb[10].mxu1 %vm218_vm1, %v2750_v31 }
 0xb12   :  { %739 = vmatprep.mubr.f32.mxu1 %v2605_v0  ;;  %2323 = vmatpush1.bf16.msra.mxu1 %v2322_v36  ;;  %v988_v36 = vld [vmem:[#allocation4 + $0xe8] sm:$0xff] }
 0xb13   :  { %2357 = vmatprep.subr.bf16.mxu1 %v2336_v14 }
 0xb15   :  { %2062 = vmatmul.mubr.msk.f32.gmra.mrb[12].mxu1 %vm218_vm1, %v2730_v51  ;;  %v754_v51 = vpop.permute.xlu1 %753 }
 0xb16   :  { %745 = vmatprep.mubr.f32.mxu1 %v2605_v0 }
 0xb19   :  { %2063 = vmatmul.mubr.msk.f32.gmra.mrb[14].mxu1 %vm218_vm1, %v2707_v6  ;;  %v641_v6 = vld [vmem:[#allocation2 + $0x130] ss:$8 sm:$0x3] }
 0xb1a   :  { %821 = vmatprep.mubr.f32.mxu1 %v2605_v0  ;;  %v854_v31 = vrot.slane %v641_v6, %v68_v15 }
 0xb1d   :  { %2064 = vmatmul.mubr.msk.f32.vlgmr.msra.gmra.mrb[8].mxu1 %vm218_vm1, %v2702_v5  ;;  %v850_v5 = vrot.slane %v641_v6, %v64_v13  ;;  %v989_v6 = vld [vmem:[#allocation4 + $0xf0] sm:$0xff] }
 0xb1e   :  { %827 = vmatprep.mubr.f32.mxu1 %v2605_v0  ;;  %2359 = vmatpush1.bf16.msra.mxu1 %v2817_v20 }
 0xb1f   :  { %2361 = vmatprep.subr.bf16.mxu1 %v2821_v25 }
 0xb21   :  { %2065 = vmatmul.mubr.msk.f32.gmra.mrb[10].mxu1 %vm218_vm1, %v2725_v50 }
 0xb22   :  { %833 = vmatprep.mubr.f32.mxu1 %v2605_v0  ;;  %2363 = vmatpush1.bf16.msra.mxu1 %v2823_v30 }
 0xb23   :  { %2377 = vmatprep.subr.bf16.mxu1 %v2336_v14 }
 0xb25   :  { %2066 = vmatmul.mubr.msk.f32.gmra.mrb[12].mxu1 %vm218_vm1, %v2745_v29 }
 0xb26   :  { %839 = vmatprep.mubr.f32.mxu1 %v2605_v0 }
 0xb29   :  { %2067 = vmatmul.mubr.msk.f32.gmra.mrb[14].mxu1 %vm218_vm1, %v754_v51  ;;  %v2331_v51 = vpack.c.bf16 %v988_v36, %v987_v35 }
 0xb2a   :  { %1426 = vmatprep.mubr.f32.mxu1 %v2605_v0 }
 0xbf0   :  { %v823_v50 = vpop.f32.mrb[8].mxu1 }
 0xbf1   :  { %v857_v37 = vadd.f32 %v850_v5, %v823_v50  ;;  %v825_v38 = vpop.f32.mrb[9].mxu1 }
 0xbf2   :  { %v2790_v39 = vadd.f32 %v854_v31, %v825_v38 }
 0xbf3   :  { %v2068_v29 = vmul.f32 -1.442695, %v857_v37 }
 0xbf4   :  { %v829_v40 = vpop.f32.mrb[10].mxu1 }
 0xbf5   :  { %2503 = vpow2.f32 %v2068_v29  ;;  %v2792_v41 = vadd.f32 %v850_v5, %v829_v40  ;;  %v831_v42 = vpop.f32.mrb[11].mxu1 }
 0xbf6   :  { %v2794_v43 = vadd.f32 %v854_v31, %v831_v42 }
 0xbf8   :  { %v835_v44 = vpop.f32.mrb[12].mxu1 }
 0xbf9   :  { %v2796_v45 = vadd.f32 %v850_v5, %v835_v44  ;;  %v837_v13 = vpop.f32.mrb[13].mxu1 }
 0xbfa   :  { %v2798_v46 = vadd.f32 %v854_v31, %v837_v13 }
 0xbfc   :  { %v841_v12 = vpop.f32.mrb[14].mxu1 }
 0xbfd   :  { %v2800_v15 = vadd.f32 %v850_v5, %v841_v12  ;;  %v843_v32 = vpop.f32.mrb[15].mxu1  ;;  %v990_v5 = vld [vmem:[#allocation4 + $0xf8] sm:$0xff] }
 0xbfe   :  { %v864_v47 = vadd.f32 %v854_v31, %v843_v32  ;;  %v2334_v50 = vpack.c.bf16 %v990_v5, %v989_v6 }
 0xbff   :  { %v2504_v48 = vpop.eup %2503 }
 0xc00   :  { %v871_v49 = vadd.f32 1.0, %v2504_v48  ;;  %v2069_v52 = vmul.f32 -1.442695, %v864_v47 }
 0xc02   :  { %2505 = vrcp.f32 %v871_v49 }
 0xc03   :  { %2507 = vpow2.f32 %v2069_v52 }
 0xc0c   :  { %v2506_v21 = vpop.eup %2505 }
 0xc0d   :  { %v2508_v53 = vpop.eup %2507  ;;  %v877_v54 = vmul.f32 2.0, %v2506_v21 }
 0xc0e   :  { %v872_v55 = vadd.f32 1.0, %v2508_v53 }
 0xc0f   :  { %v2070_v56 = vadd.f32 -1.0, %v877_v54 }
 0xc10   :  { %2509 = vrcp.f32 %v872_v55 }
 0xc11   :  { %883 = vrot.lane.b32.xlu0 %v2070_v56, %s2606_s0 }
 0xc1a   :  { %v2510_v57 = vpop.eup %2509 }
 0xc1b   :  { %v878_v58 = vmul.f32 2.0, %v2510_v57 }
 0xc1d   :  { %v2071_v59 = vadd.f32 -1.0, %v878_v58 }
 0xc1f   :  { %885 = vrot.lane.b32.xlu1 %v2071_v59, %s2606_s0 }
 0xc83   :  { %v884_v60 = vpop.permute.xlu0 %883 }
 0xc84   :  { %v2804_v61 = vmul.f32 %v2506_v21, %v884_v60 }
 0xc86   :  { %2511 = vtanh.f32 %v2804_v61 }
 0xc90   :  { %v2512_v62 = vpop.eup %2511 }
 0xc91   :  { %v886_v63 = vpop.permute.xlu1 %885  ;;  %895 = vrot.lane.b32.xlu0 %v2512_v62, %s2607_s19 }
 0xc92   :  { %v2808_v1 = vmul.f32 %v2510_v57, %v886_v63 }
 0xc94   :  { %2513 = vtanh.f32 %v2808_v1 }
 0xc9e   :  { %v2514_v26 = vpop.eup %2513 }
 0xc9f   :  { %897 = vrot.lane.b32.xlu1 %v2514_v26, %s2607_s19 }
 0xd03   :  { %v896_v16 = vpop.permute.xlu0 %895 }
 0xd04   :  { %v901_v17 = vmul.f32 %v2506_v21, %v896_v16 }
 0xd06   :  { %908 = vrot.lane.b32.xlu0 %v901_v17, %s2608_s20 }
 0xd11   :  { %v898_v33 = vpop.permute.xlu1 %897 }
 0xd12   :  { %v902_v34 = vmul.f32 %v2510_v57, %v898_v33  ;;  %v1284_v33 = vld [vmem:[#allocation4 + $0xb0] sm:$0xff] }
 0xd14   :  { %992 = vrot.lane.b32.xlu1 %v902_v34, %s2608_s20  ;;  %v1285_v34 = vld [vmem:[#allocation4 + $0xb8] sm:$0xff] }
 0xd15   :  { %v2354_v36 = vpack.c.bf16 %v1285_v34, %v1284_v33 }
 0xd78   :  { %v909_v31 = vpop.permute.xlu0 %908 }
 0xd79   :  { %2166 = vmatmul.mubr.msk.f32.vlgmr.msra.gmra.mrb[12].mxu0 %vm218_vm1, %v909_v31 }
 0xd7a   :  { %2332 = vmatpush3.bf16.msra.mxu0 %v2331_v51  ;;  %2176 = vmatprep.mubr.msk.f32.mxu0 %vm2610_vm2, %v2605_v0 }
 0xd7b   :  { %2333 = vmatprep.subr.bf16.mxu0 %v2609_v4 }
 0xd7e   :  { %2335 = vmatpush3.bf16.msra.mxu0 %v2334_v50 }
 0xd7f   :  { %2337 = vmatprep.subr.bf16.mxu0 %v2336_v14 }
 0xd86   :  { %v993_v37 = vpop.permute.xlu1 %992 }
 0xd87   :  { %2177 = vmatmul.mubr.msk.f32.vlgmr.msra.gmra.mrb[12].mxu0 %vm218_vm1, %v993_v37 }
 0xd88   :  { %2339 = vmatpush1.bf16.msra.mxu0 %v2817_v20  ;;  %1131 = vmatprep.mubr.f32.mxu0 %v2605_v0 }
 0xd89   :  { %2341 = vmatprep.subr.bf16.mxu0 %v2821_v25 }
 0xd8c   :  { %2343 = vmatpush1.bf16.msra.mxu0 %v2823_v30 }
 0xd8d   :  { %2344 = vmatprep.subr.bf16.mxu0 %v2609_v4 }
 0xd8f   :  { %2075 = vmatmul.mubr.msk.f32.vlgmr.msra.gmra.mrb[14].mxu0 %vm218_vm1, %v909_v31 }
 0xd90   :  { %1136 = vmatprep.mubr.f32.mxu0 %v2605_v0 }
 0xd93   :  { %2076 = vmatmul.mubr.msk.f32.gmra.mrb[16].mxu0 %vm218_vm1, %v993_v37 }
 0xd94   :  { %2187 = vmatprep.mubr.msk.f32.mxu0 %vm2610_vm2, %v2605_v0 }
 0xe62   :  { %v1133_v38 = vpop.f32.mrb[14].mxu0 }
 0xe63   :  { %v1142_v29 = vadd.f32 %v1133_v38, %v2792_v41  ;;  %v1135_v40 = vpop.f32.mrb[15].mxu0 }
 0xe65   :  { %v2077_v42 = vmul.f32 -1.442695, %v1142_v29 }
 0xe66   :  { %v1138_v44 = vpop.f32.mrb[16].mxu0 }
 0xe67   :  { %2515 = vpow2.f32 %v2077_v42  ;;  %v1139_v13 = vpop.f32.mrb[17].mxu0 }
 0xe68   :  { %v1143_v12 = vadd.f32 %v1139_v13, %v2798_v46 }
 0xe6a   :  { %v2078_v32 = vmul.f32 -1.442695, %v1143_v12 }
 0xe6c   :  { %2517 = vpow2.f32 %v2078_v32 }
 0xe71   :  { %v2516_v47 = vpop.eup %2515 }
 0xe72   :  { %v1150_v48 = vadd.f32 1.0, %v2516_v47 }
 0xe74   :  { %2519 = vrcp.f32 %v1150_v48 }
 0xe76   :  { %v2518_v49 = vpop.eup %2517 }
 0xe77   :  { %v1151_v52 = vadd.f32 1.0, %v2518_v49 }
 0xe79   :  { %2521 = vrcp.f32 %v1151_v52 }
 0xe7e   :  { %v2520_v21 = vpop.eup %2519 }
 0xe7f   :  { %v1156_v53 = vmul.f32 2.0, %v2520_v21 }
 0xe81   :  { %v2079_v54 = vadd.f32 -1.0, %v1156_v53 }
 0xe83   :  { %v2522_v55 = vpop.eup %2521  ;;  %1172 = vrot.lane.b32.xlu0 %v2079_v54, %s2606_s0 }
 0xe84   :  { %v1157_v41 = vmul.f32 2.0, %v2522_v55 }
 0xe86   :  { %v2080_v56 = vadd.f32 -1.0, %v1157_v41 }
 0xe87   :  { %1162 = vrot.lane.b32.xlu0 %v2804_v61, %s2608_s20 }
 0xe88   :  { %1174 = vrot.lane.b32.xlu1 %v2080_v56, %s2606_s0 }
 0xe8b   :  { %1164 = vrot.lane.b32.xlu0 %v2808_v1, %s2608_s20  ;;  %v1202_v1 = vld [vmem:[#allocation4 + $0x40] sm:$0xff] }
 0xe8c   :  { %v2345_v26 = vpack.c.bf16 %v1203_v8, %v1202_v1  ;;  %v1569_v1 = vld [vmem:[#allocation4 + $0x60] sm:$0xff]  ;;  %v1570_v8 = vld [vmem:[#allocation4 + $0x68] sm:$0xff] }
 0xe8d   :  { %v2371_v9 = vpack.c.bf16 %v1570_v8, %v1569_v1  ;;  %v1946_v8 = vld [vmem:[#allocation4 + $0x158] sm:$0xff] }
 0xe8e   :  { %2346 = vmatpush3.bf16.msra.mxu0 %v2345_v26  ;;  %v1571_v26 = vld [vmem:[#allocation4 + $0x70] sm:$0xff] }
 0xe8f   :  { %2347 = vmatprep.subr.bf16.mxu0 %v2609_v4 }
 0xe92   :  { %2349 = vmatpush3.bf16.msra.mxu0 %v2348_v11 }
 0xe93   :  { %2350 = vmatprep.subr.bf16.mxu0 %v2609_v4 }
 0xef5   :  { %v1173_v46 = vpop.permute.xlu0 %1172 }
 0xef6   :  { %v1178_v57 = vmul.f32 %v2520_v21, %v1173_v46  ;;  %v1489_v46 = vld [vmem:[#allocation4 + $0x80] sm:$0xff] }
 0xef8   :  { %1182 = vrot.lane.b32.xlu1 %v1178_v57, %s2608_s20  ;;  %v1490_v57 = vld [vmem:[#allocation4 + $0x88] sm:$0xff] }
 0xef9   :  { %v1163_v60 = vpop.permute.xlu0 %1162 }
 0xefa   :  { %v1175_v58 = vpop.permute.xlu1 %1174  ;;  %v1168_v62 = vmul.f32 %v2520_v21, %v1163_v60  ;;  %v1492_v60 = vld [vmem:[#allocation4 + $0x98] sm:$0xff] }
 0xefb   :  { %v1179_v59 = vmul.f32 %v2522_v55, %v1175_v58  ;;  %v1491_v58 = vld [vmem:[#allocation4 + $0x90] sm:$0xff] }
 0xefd   :  { %1184 = vrot.lane.b32.xlu1 %v1179_v59, %s2608_s20  ;;  %v1165_v2 = vpop.permute.xlu0 %1164  ;;  %v2365_v59 = vpack.c.bf16 %v1490_v57, %v1489_v46 }
 0xefe   :  { %v1169_v61 = vmul.f32 %v2522_v55, %v1165_v2 }
 0xf6a   :  { %v1183_v63 = vpop.permute.xlu1 %1182 }
 0xf6b   :  { %v2853_v3 = vadd.f32 %v1183_v63, %v1168_v62  ;;  %v2368_v62 = vpack.c.bf16 %v1492_v60, %v1491_v58  ;;  %v1940_v58 = vld [vmem:[#allocation4 + $0x128] sm:$0xff] }
 0xf6d   :  { %2523 = vtanh.f32 %v2853_v3 }
 0xf6f   :  { %v1185_v28 = vpop.permute.xlu1 %1184 }
 0xf70   :  { %v2856_v7 = vadd.f32 %v1185_v28, %v1169_v61 }
 0xf72   :  { %2525 = vtanh.f32 %v2856_v7 }
 0xf77   :  { %v2524_v14 = vpop.eup %2523 }
 0xf78   :  { %1194 = vrot.lane.b32.xlu0 %v2524_v14, %s2606_s0  ;;  %v2374_v14 = vpack.c.bf16 %v1572_v10, %v1571_v26  ;;  %v1948_v10 = vld [vmem:[#allocation4 + $0x168] sm:$0xff] }
 0xf7c   :  { %v2526_v16 = vpop.eup %2525 }
 0xf7d   :  { %1196 = vrot.lane.b32.xlu1 %v2526_v16, %s2606_s0 }
 0xfea   :  { %v1195_v17 = vpop.permute.xlu0 %1194 }
 0xfeb   :  { %v1200_v18 = vmul.f32 %v2520_v21, %v1195_v17 }
 0xfed   :  { %1207 = vrot.lane.b32.xlu0 %v1200_v18, %s2608_s20 }
 0xfef   :  { %v1197_v19 = vpop.permute.xlu1 %1196 }
 0xff0   :  { %v1201_v22 = vmul.f32 %v2522_v55, %v1197_v19 }
 0xff2   :  { %1287 = vrot.lane.b32.xlu1 %v1201_v22, %s2608_s20 }
0x105f   :  { %v1208_v35 = vpop.permute.xlu0 %1207 }
0x1060   :  { %2188 = vmatmul.mubr.msk.f32.vlgmr.msra.gmra.mrb[12].mxu0 %vm218_vm1, %v1208_v35  ;;  %2083 = vmatmul.mubr.msk.f32.vlgmr.msra.gmra.mrb[16].mxu1 %vm218_vm1, %v1208_v35 }
0x1061   :  { %2352 = vmatpush3.bf16.msra.mxu0 %v2351_v24  ;;  %1431 = vmatprep.mubr.f32.mxu1 %v2605_v0 }
0x1062   :  { %2353 = vmatprep.subr.bf16.mxu0 %v2609_v4  ;;  %2198 = vmatprep.mubr.msk.f32.mxu0 %vm2610_vm2, %v2605_v0 }
0x1063   :  { %2379 = vmatpush1.bf16.msra.mxu1 %v2817_v20 }
0x1064   :  { %v1288_v51 = vpop.permute.xlu1 %1287  ;;  %2381 = vmatprep.subr.bf16.mxu1 %v2821_v25 }
0x1065   :  { %2355 = vmatpush3.bf16.msra.mxu0 %v2354_v36  ;;  %2084 = vmatmul.mubr.msk.f32.gmra.mrb[18].mxu1 %vm218_vm1, %v1288_v51 }
0x1066   :  { %2364 = vmatprep.subr.bf16.mxu0 %v2609_v4  ;;  %1713 = vmatprep.mubr.f32.mxu1 %v2605_v0 }
0x1067   :  { %2383 = vmatpush1.bf16.msra.mxu1 %v2823_v30 }
0x1068   :  { %2199 = vmatmul.mubr.msk.f32.vlgmr.msra.gmra.mrb[12].mxu0 %vm218_vm1, %v1288_v51  ;;  %2396 = vmatprep.subr.bf16.mxu1 %v2609_v4 }
0x1069   :  { %2209 = vmatprep.mubr.msk.f32.mxu0 %vm2610_vm2, %v2605_v0  ;;  %2366 = vmatpush3.bf16.msra.mxu0 %v2365_v59  ;;  %v1941_v59 = vld [vmem:[#allocation4 + $0x130] sm:$0xff] }
0x106a   :  { %2367 = vmatprep.subr.bf16.mxu0 %v2609_v4  ;;  %v2403_v60 = vpack.c.bf16 %v1941_v59, %v1940_v58 }
0x106d   :  { %2369 = vmatpush3.bf16.msra.mxu0 %v2368_v62  ;;  %v1942_v62 = vld [vmem:[#allocation4 + $0x138] sm:$0xff] }
0x106e   :  { %2370 = vmatprep.subr.bf16.mxu0 %v2609_v4 }
0x1133   :  { %v1428_v20 = vpop.f32.mrb[16].mxu1 }
0x1134   :  { %v1437_v6 = vadd.f32 %v1428_v20, %v2796_v45  ;;  %v1430_v25 = vpop.f32.mrb[17].mxu1 }
0x1136   :  { %v2085_v5 = vmul.f32 -1.442695, %v1437_v6 }
0x1138   :  { %2527 = vpow2.f32 %v2085_v5  ;;  %v1433_v31 = vpop.f32.mrb[18].mxu1 }
0x1139   :  { %v1434_v50 = vpop.f32.mrb[19].mxu1 }
0x113a   :  { %v1438_v37 = vadd.f32 %v1434_v50, %v2794_v43 }
0x113c   :  { %v2086_v38 = vmul.f32 -1.442695, %v1438_v37 }
0x113e   :  { %2529 = vpow2.f32 %v2086_v38 }
0x1142   :  { %v2528_v30 = vpop.eup %2527 }
0x1143   :  { %v1445_v29 = vadd.f32 1.0, %v2528_v30 }
0x1145   :  { %2531 = vrcp.f32 %v1445_v29 }
0x1148   :  { %v2530_v40 = vpop.eup %2529 }
0x1149   :  { %v1446_v42 = vadd.f32 1.0, %v2530_v40 }
0x114b   :  { %2533 = vrcp.f32 %v1446_v42 }
0x114f   :  { %v2532_v44 = vpop.eup %2531 }
0x1150   :  { %v1451_v13 = vmul.f32 2.0, %v2532_v44  ;;  %v1455_v21 = vmul.f32 %v2532_v44, %v2853_v3 }
0x1152   :  { %v2087_v12 = vadd.f32 -1.0, %v1451_v13 }
0x1154   :  { %1459 = vrot.lane.b32.xlu0 %v2087_v12, %s2606_s0  ;;  %v1776_v12 = vld [vmem:[#allocation4 + $0xc0] sm:$0xff] }
0x1155   :  { %v2534_v45 = vpop.eup %2533 }
0x1156   :  { %v1452_v32 = vmul.f32 2.0, %v2534_v45  ;;  %v1456_v55 = vmul.f32 %v2534_v45, %v2856_v7 }
0x1158   :  { %v2088_v47 = vadd.f32 -1.0, %v1452_v32  ;;  %v1778_v32 = vld [vmem:[#allocation4 + $0xd0] sm:$0xff] }
0x115a   :  { %1461 = vrot.lane.b32.xlu1 %v2088_v47, %s2606_s0 }
0x11c6   :  { %v1460_v48 = vpop.permute.xlu0 %1459 }
0x11c7   :  { %v1465_v43 = vmul.f32 %v2532_v44, %v1460_v48  ;;  %v1779_v48 = vld [vmem:[#allocation4 + $0xd8] sm:$0xff] }
0x11c9   :  { %1469 = vrot.lane.b32.xlu0 %v1465_v43, %s2608_s20 }
0x11cc   :  { %v1462_v49 = vpop.permute.xlu1 %1461 }
0x11cd   :  { %v1466_v52 = vmul.f32 %v2534_v45, %v1462_v49  ;;  %v2388_v49 = vpack.c.bf16 %v1779_v48, %v1778_v32 }
0x11cf   :  { %1471 = vrot.lane.b32.xlu1 %v1466_v52, %s2608_s20 }
0x123b   :  { %v1470_v53 = vpop.permute.xlu0 %1469 }
0x123c   :  { %v2888_v54 = vadd.f32 %v1470_v53, %v1455_v21  ;;  %v1936_v21 = vld [vmem:[#allocation4 + $0x108] sm:$0xff]  ;;  %v1937_v53 = vld [vmem:[#allocation4 + $0x110] sm:$0xff] }
0x123e   :  { %2535 = vtanh.f32 %v2888_v54 }
0x1241   :  { %v1472_v41 = vpop.permute.xlu1 %1471 }
0x1242   :  { %v2892_v56 = vadd.f32 %v1472_v41, %v1456_v55  ;;  %v2397_v55 = vpack.c.bf16 %v1937_v53, %v1936_v21  ;;  %v1939_v41 = vld [vmem:[#allocation4 + $0x120] sm:$0xff] }
0x1244   :  { %2537 = vtanh.f32 %v2892_v56 }
0x1248   :  { %v2536_v63 = vpop.eup %2535 }
0x1249   :  { %1481 = vrot.lane.b32.xlu0 %v2536_v63, %s2606_s0  ;;  %v1943_v63 = vld [vmem:[#allocation4 + $0x140] sm:$0xff] }
0x124e   :  { %v2538_v2 = vpop.eup %2537 }
0x124f   :  { %1483 = vrot.lane.b32.xlu1 %v2538_v2, %s2606_s0 }
0x12bb   :  { %v1482_v3 = vpop.permute.xlu0 %1481 }
0x12bc   :  { %v1487_v61 = vmul.f32 %v2532_v44, %v1482_v3 }
0x12be   :  { %1494 = vrot.lane.b32.xlu0 %v1487_v61, %s2608_s20  ;;  %v2406_v61 = vpack.c.bf16 %v1943_v63, %v1942_v62 }
0x12c1   :  { %v1484_v28 = vpop.permute.xlu1 %1483 }
0x12c2   :  { %v1488_v7 = vmul.f32 %v2534_v45, %v1484_v28  ;;  %v1777_v45 = vld [vmem:[#allocation4 + $0xc8] sm:$0xff] }
0x12c3   :  { %v2385_v47 = vpack.c.bf16 %v1777_v45, %v1776_v12  ;;  %v1944_v28 = vld [vmem:[#allocation4 + $0x148] sm:$0xff] }
0x12c4   :  { %1574 = vrot.lane.b32.xlu1 %v1488_v7, %s2608_s20  ;;  %v1945_v7 = vld [vmem:[#allocation4 + $0x150] sm:$0xff] }
0x12c5   :  { %v2409_v1 = vpack.c.bf16 %v1945_v7, %v1944_v28 }
0x1330   :  { %v1495_v11 = vpop.permute.xlu0 %1494 }
0x1331   :  { %2210 = vmatmul.mubr.msk.f32.vlgmr.msra.gmra.mrb[12].mxu0 %vm218_vm1, %v1495_v11  ;;  %2091 = vmatmul.mubr.msk.f32.vlgmr.msra.gmra.mrb[20].mxu1 %vm218_vm1, %v1495_v11  ;;  %v1949_v11 = vld [vmem:[#allocation4 + $0x170] sm:$0xff] }
0x1332   :  { %2372 = vmatpush3.bf16.msra.mxu0 %v2371_v9  ;;  %1718 = vmatprep.mubr.f32.mxu1 %v2605_v0  ;;  %v1947_v9 = vld [vmem:[#allocation4 + $0x160] sm:$0xff] }
0x1333   :  { %2373 = vmatprep.subr.bf16.mxu0 %v2609_v4  ;;  %2220 = vmatprep.mubr.msk.f32.mxu0 %vm2610_vm2, %v2605_v0  ;;  %v2412_v26 = vpack.c.bf16 %v1947_v9, %v1946_v8 }
0x1334   :  { %2398 = vmatpush3.bf16.msra.mxu1 %v2397_v55 }
0x1335   :  { %2399 = vmatprep.subr.bf16.mxu1 %v2609_v4 }
0x1336   :  { %2375 = vmatpush3.bf16.msra.mxu0 %v2374_v14  ;;  %v1575_v16 = vpop.permute.xlu1 %1574  ;;  %v2415_v14 = vpack.c.bf16 %v1949_v11, %v1948_v10 }
0x1337   :  { %2092 = vmatmul.mubr.msk.f32.gmra.mrb[22].mxu1 %vm218_vm1, %v1575_v16  ;;  %2384 = vmatprep.subr.bf16.mxu0 %v2609_v4 }
0x1338   :  { %2277 = vmatprep.mubr.msk.f32.mxu1 %vm2610_vm2, %v2605_v0 }
0x1339   :  { %2221 = vmatmul.mubr.msk.f32.vlgmr.msra.gmra.mrb[12].mxu0 %vm218_vm1, %v1575_v16  ;;  %v1856_v16 = vld [vmem:[#allocation4 + $0x20] sm:$0xff] }
0x133a   :  { %2231 = vmatprep.mubr.msk.f32.mxu0 %vm2610_vm2, %v2605_v0  ;;  %2386 = vmatpush3.bf16.msra.mxu0 %v2385_v47 }
0x133b   :  { %2387 = vmatprep.subr.bf16.mxu0 %v2609_v4 }
0x133e   :  { %2389 = vmatpush3.bf16.msra.mxu0 %v2388_v49 }
0x133f   :  { %2390 = vmatprep.subr.bf16.mxu0 %v2609_v4 }
0x1404   :  { %v1715_v17 = vpop.f32.mrb[20].mxu1 }
0x1405   :  { %v1724_v18 = vadd.f32 %v1715_v17, %v2800_v15  ;;  %v1717_v19 = vpop.f32.mrb[21].mxu1  ;;  %v1857_v17 = vld [vmem:[#allocation4 + $0x28] sm:$0xff] }
0x1406   :  { %v1858_v19 = vld [vmem:[#allocation4 + $0x30] sm:$0xff] }
0x1407   :  { %v2093_v22 = vmul.f32 -1.442695, %v1724_v18  ;;  %v2391_v18 = vpack.c.bf16 %v1857_v17, %v1856_v16 }
0x1409   :  { %2539 = vpow2.f32 %v2093_v22  ;;  %v1859_v22 = vld [vmem:[#allocation4 + $0x38] sm:$0xff] }
0x140a   :  { %v1720_v23 = vpop.f32.mrb[22].mxu1 }
0x140b   :  { %v1721_v27 = vpop.f32.mrb[23].mxu1 }
0x140c   :  { %v1725_v24 = vadd.f32 %v1721_v27, %v2790_v39  ;;  %v2394_v27 = vpack.c.bf16 %v1859_v22, %v1858_v19 }
0x140e   :  { %v2094_v33 = vmul.f32 -1.442695, %v1725_v24 }
0x1410   :  { %2541 = vpow2.f32 %v2094_v33  ;;  %v1950_v33 = vld [vmem:[#allocation4 + $0x178] sm:$0xff] }
0x1413   :  { %v2540_v34 = vpop.eup %2539 }
0x1414   :  { %v1732_v35 = vadd.f32 1.0, %v2540_v34  ;;  %v1951_v34 = vld [vmem:[#allocation4 + $0x180] sm:$0xff] }
0x1416   :  { %2543 = vrcp.f32 %v1732_v35  ;;  %v2418_v35 = vpack.c.bf16 %v1951_v34, %v1950_v33 }
0x141a   :  { %v2542_v36 = vpop.eup %2541 }
0x141b   :  { %v1733_v51 = vadd.f32 1.0, %v2542_v36  ;;  %v2073_v36 = vld [vmem:[#allocation4 + $0x100] ss:$0 sm:$0xff] }
0x141d   :  { %2545 = vrcp.f32 %v1733_v51 }
0x1420   :  { %v2544_v20 = vpop.eup %2543 }
0x1421   :  { %v1738_v6 = vmul.f32 2.0, %v2544_v20  ;;  %v1742_v30 = vmul.f32 %v2544_v20, %v2888_v54  ;;  %v1938_v54 = vld [vmem:[#allocation4 + $0x118] sm:$0xff] }
0x1422   :  { %v2400_v57 = vpack.c.bf16 %v1939_v41, %v1938_v54 }
0x1423   :  { %v2095_v25 = vadd.f32 -1.0, %v1738_v6 }
0x1424   :  { %2401 = vmatpush3.bf16.msra.mxu1 %v2400_v57 }
0x1425   :  { %1746 = vrot.lane.b32.xlu0 %v2095_v25, %s2606_s0  ;;  %2402 = vmatprep.subr.bf16.mxu1 %v2609_v4  ;;  %v2099_v25 = vld [vmem:[#allocation4 + $0x188] ss:$0 sm:$0xff] }
0x1427   :  { %v2546_v15 = vpop.eup %2545 }
0x1428   :  { %v1739_v5 = vmul.f32 2.0, %v2546_v15  ;;  %v1743_v42 = vmul.f32 %v2546_v15, %v2892_v56  ;;  %2404 = vmatpush3.bf16.msra.mxu1 %v2403_v60 }
0x1429   :  { %2405 = vmatprep.subr.bf16.mxu1 %v2609_v4 }
0x142a   :  { %v2096_v31 = vadd.f32 -1.0, %v1739_v5 }
0x142c   :  { %1748 = vrot.lane.b32.xlu1 %v2096_v31, %s2606_s0  ;;  %2407 = vmatpush3.bf16.msra.mxu1 %v2406_v61 }
0x142d   :  { %2408 = vmatprep.subr.bf16.mxu1 %v2609_v4 }
0x1430   :  { %2410 = vmatpush3.bf16.msra.mxu1 %v2409_v1 }
0x1431   :  { %2411 = vmatprep.subr.bf16.mxu1 %v2609_v4 }
0x1434   :  { %2413 = vmatpush3.bf16.msra.mxu1 %v2412_v26 }
0x1435   :  { %2414 = vmatprep.subr.bf16.mxu1 %v2609_v4 }
0x1438   :  { %2416 = vmatpush3.bf16.msra.mxu1 %v2415_v14 }
0x1439   :  { %2417 = vmatprep.subr.bf16.mxu1 %v2609_v4 }
0x143c   :  { %2419 = vmatpush3.bf16.msra.mxu1 %v2418_v35 }
0x1497   :  { %v1747_v50 = vpop.permute.xlu0 %1746 }
0x1498   :  { %v1752_v39 = vmul.f32 %v2544_v20, %v1747_v50 }
0x149a   :  { %1756 = vrot.lane.b32.xlu0 %v1752_v39, %s2608_s20 }
0x149e   :  { %v1749_v37 = vpop.permute.xlu1 %1748 }
0x149f   :  { %v1753_v38 = vmul.f32 %v2546_v15, %v1749_v37 }
0x14a1   :  { %1758 = vrot.lane.b32.xlu1 %v1753_v38, %s2608_s20 }
0x150c   :  { %v1757_v29 = vpop.permute.xlu0 %1756 }
0x150d   :  { %v1762_v40 = vadd.f32 %v1757_v29, %v1742_v30 }
0x150f   :  { %2547 = vtanh.f32 %v1762_v40 }
0x1513   :  { %v1759_v44 = vpop.permute.xlu1 %1758 }
0x1514   :  { %v1763_v13 = vadd.f32 %v1759_v44, %v1743_v42 }
0x1516   :  { %2549 = vtanh.f32 %v1763_v13 }
0x1519   :  { %v2548_v43 = vpop.eup %2547 }
0x151a   :  { %1768 = vrot.lane.b32.xlu0 %v2548_v43, %s2606_s0 }
0x1520   :  { %v2550_v52 = vpop.eup %2549 }
0x1521   :  { %1770 = vrot.lane.b32.xlu1 %v2550_v52, %s2606_s0 }
0x158c   :  { %v1769_v56 = vpop.permute.xlu0 %1768 }
0x158d   :  { %v1774_v46 = vmul.f32 %v2544_v20, %v1769_v56 }
0x158f   :  { %1781 = vrot.lane.b32.xlu0 %v1774_v46, %s2608_s20 }
0x1593   :  { %v1771_v2 = vpop.permute.xlu1 %1770 }
0x1594   :  { %v1775_v3 = vmul.f32 %v2546_v15, %v1771_v2 }
0x1596   :  { %1861 = vrot.lane.b32.xlu1 %v1775_v3, %s2608_s20 }
0x1601   :  { %v1782_v23 = vpop.permute.xlu0 %1781 }
0x1602   :  { %2232 = vmatmul.mubr.msk.f32.vlgmr.msra.gmra.mrb[12].mxu0 %vm218_vm1, %v1782_v23 }
0x1603   :  { %2392 = vmatpush3.bf16.msra.mxu0 %v2391_v18  ;;  %2242 = vmatprep.mubr.msk.f32.mxu0 %vm2610_vm2, %v2605_v0 }
0x1604   :  { %2393 = vmatprep.subr.bf16.mxu0 %v2609_v4 }
0x1607   :  { %2395 = vmatpush3.bf16.msra.mxu0 %v2394_v27 }
0x1608   :  { %v1862_v24 = vpop.permute.xlu1 %1861 }
0x160a   :  { %2243 = vmatmul.mubr.msk.f32.vlgmr.msra.gmra.mrb[12].mxu0 %vm218_vm1, %v1862_v24 }
0x16dd   :  { %v1931_v51 = vpop.f32.mrb[12].mxu0 }
0x16de   :  { %v2420_v20 = vadd.f32 %v2073_v36, %v1931_v51  ;;  %v2244_v6 = vpop.f32.mrb[13].mxu0 }
0x16e0   :  { %2278 = vmatmul.mubr.f32.vlgmr.msra.gmra.mrb[24].mxu1 %v2420_v20 }
0x17b3   :  { %v2023_v15 = vpop.f32.mrb[24].mxu1 }
0x17b4   :  { %v2024_v5 = vadd.f32 %v2099_v25, %v2023_v15  ;;  %v2279_v31 = vpop.f32.mrb[25].mxu1 }
0x17b6   :  { %2027 = vst [vmem:[%s2946_s3] sm:$0xff] %v2024_v5 }
0x17b7   :  { %2032 = vsyncpa [#allocation3], 1 }
0x17b8   :  { %2033 = vsyncpa [#allocation5], 1 }

</bundles_post_ra>
